<compile_context>
chip_gen: v7x
topology: tpu7x:2x2x1
jax: 0.10.0
libtpu: 0.0.40
codegen_flags: <defaults>
</compile_context>

<pallas_src>
import math
import jax
import jax.numpy as jnp
from jax import lax
from jax.experimental import pallas as pl
from jax.experimental.pallas import tpu as pltpu

# ----------------------- small, module-consistent config -----------------------
B = 2                      # batch
L = 8                      # configs.seq_len
PRED = 4                   # configs.pred_len
ENC_IN = 4                 # configs.enc_in
C_OUT = 4                  # configs.c_out (== enc_in so de-norm broadcast matches torch)
D_MODEL = 32               # configs.d_model
D_STATE = 8                # configs.d_state
D_CONV = 4                 # configs.d_conv
EXPAND = 2                 # configs.expand
D_INNER = EXPAND * D_MODEL             # 64
DT_RANK = math.ceil(D_MODEL / 16)      # 2
BL = B * L


def _silu(x):
    return x * (1.0 / (1.0 + jnp.exp(-x)))


def _softplus(x):
    return jnp.maximum(x, 0.0) + jnp.log(1.0 + jnp.exp(-jnp.abs(x)))


def mamba_forecast_kernel(x_ref, pe_ref, wemb_ref, win_ref, wx_ref,
                          packa_ref, wout_ref, wprojb_ref, wolb_ref, o_ref):
    f32 = jnp.float32

    # ---- unpack the small packed parameters (static slices, D_INNER lanes) ----
    alog = packa_ref[0:D_STATE, :]                               # (D_STATE, D_INNER)
    convw = packa_ref[D_STATE:D_STATE + D_CONV, :]               # (D_CONV, D_INNER)
    wdt = packa_ref[D_STATE + D_CONV:D_STATE + D_CONV + DT_RANK, :]
    base = D_STATE + D_CONV + DT_RANK
    convb = packa_ref[base:base + 1, :]                          # (1, D_INNER)
    bdt = packa_ref[base + 1:base + 2, :]
    dvec = packa_ref[base + 2:base + 3, :]

    # ---- per-batch instance norm (torch mean/var dim=1, unbiased=False) and
    #      circular conv taps for the TokenEmbedding (kept per-batch 2-D) ----
    stats = []
    taps_rows = []
    for b in range(B):
        xb = x_ref[b]                                            # (L, ENC_IN)
        mean = jnp.mean(xb, axis=0, keepdims=True)
        xc = xb - mean
        var = jnp.mean(xc * xc, axis=0, keepdims=True)
        std = jnp.sqrt(var + 1e-5)
        xn = xc / std
        stats.append((mean, std))
        taps_rows.append(jnp.concatenate(
            [jnp.roll(xn, 1, axis=0), xn, jnp.roll(xn, -1, axis=0)], axis=1))
    taps = jnp.concatenate(taps_rows, axis=0)                    # (B*L, 3*ENC_IN)

    # ---- DataEmbedding: ONE fused matmul over the 3 conv taps + sinusoidal PE ----
    emb = jnp.dot(taps, wemb_ref[...], preferred_element_type=f32) + pe_ref[...]
    # TODO(synk): dropout omitted (identity in eval mode)

    # ---- Mamba in_proj: single fused, lane-dense (128-wide) matmul ----
    xz = jnp.dot(emb, win_ref[...], preferred_element_type=f32)  # (B*L, 2*D_INNER)
    xin = xz[:, :D_INNER]
    z = xz[:, D_INNER:]

    # ---- depthwise causal conv1d (kernel D_CONV, zero left-pad) + SiLU,
    #      done batched in 2-D with a within-batch causal mask ----
    t_in_batch = lax.broadcasted_iota(jnp.int32, (BL, 1), 0) % L
    xpad = jnp.concatenate([jnp.zeros((D_CONV - 1, D_INNER), f32), xin], axis=0)
    acc = jnp.broadcast_to(convb, (BL, D_INNER))
    for k in range(D_CONV):
        shift = D_CONV - 1 - k                                   # tap uses x[t - shift]
        tap = xpad[k:k + BL, :]
        if shift > 0:
            tap = jnp.where(t_in_batch >= shift, tap, 0.0)       # zero pad / batch guard
        acc = acc + tap * convw[k:k + 1, :]
    u = _silu(acc)                                               # (B*L, D_INNER)

    # ---- x_proj (ONE fused matmul; columns ordered [B | C | dt]) + dt_proj ----
    proj = jnp.dot(u, wx_ref[...], preferred_element_type=f32)   # (B*L, 2*D_STATE+DT_RANK)
    Bm = proj[:, :D_STATE]
    Cm = proj[:, D_STATE:2 * D_STATE]
    dt_low = proj[:, 2 * D_STATE:2 * D_STATE + DT_RANK]
    delta = _softplus(jnp.dot(dt_low, wdt, preferred_element_type=f32) + bdt)

    # ---- selective scan: exp / dBu precomputed for all timesteps, the serial
    #      loop is only h = dA*h + dBu plus a sublane reduce (no MXU, no VMEM) ----
    A_t = -jnp.exp(alog)                                         # (D_STATE, D_INNER)
    y_parts = []
    for b in range(B):
        sl = slice(b * L, (b + 1) * L)
        d_b = delta[sl]                                          # (L, D_INNER)
        u_b = u[sl]
        dA = jnp.exp(d_b[:, None, :] * A_t)                      # (L, D_STATE, D_INNER)
        dBu = Bm[sl][:, :, None] * (d_b * u_b)[:, None, :]       # (L, D_STATE, D_INNER)
        Cc = Cm[sl][:, :, None]                                  # (L, D_STATE, 1)
        h = jnp.zeros((D_STATE, D_INNER), f32)
        rows = []
        for t in range(L):
            h = dA[t] * h + dBu[t]
            rows.append(jnp.sum(Cc[t] * h, axis=0, keepdims=True))
        y_parts.append(jnp.concatenate(rows, axis=0))            # (L, D_INNER)
    y = jnp.concatenate(y_parts, axis=0) + dvec * u              # (B*L, D_INNER)
    y = y * _silu(z)

    # ---- out_proj (no bias) + projection (with bias) ----
    mo = jnp.dot(y, wout_ref[...], preferred_element_type=f32)   # (B*L, D_MODEL)
    wproj = wprojb_ref[:D_MODEL, :]
    bproj = wprojb_ref[D_MODEL:D_MODEL + 1, :]
    pr = jnp.dot(mo, wproj, preferred_element_type=f32) + bproj  # (B*L, C_OUT)

    # ---- out_layer: Linear over the time axis + de-normalization, per batch ----
    wol = wolb_ref[:, :L]                                        # (PRED, L)
    bol = wolb_ref[:, L:L + 1]                                   # (PRED, 1)
    for b in range(B):
        pb = pr[b * L:(b + 1) * L, :]                            # (L, C_OUT)
        fin = jnp.dot(wol, pb, preferred_element_type=f32) + bol  # (PRED, C_OUT)
        mean, std = stats[b]
        # NOTE: assumes c_out == enc_in (same as the torch de-norm broadcast)
        o_ref[b] = fin * std + mean


def build_params(key):
    ks = jax.random.split(key, 12)

    def rnd(k, shape, scale=0.1):
        return jax.random.normal(k, shape, jnp.float32) * scale

    p = {}
    # TokenEmbedding conv: torch weight (D_MODEL, ENC_IN, 3); taps [x[t-1], x[t], x[t+1]]
    w_conv = rnd(ks[0], (D_MODEL, ENC_IN, 3))
    p['wemb'] = jnp.concatenate([w_conv[:, :, k].T for k in range(3)], axis=0)   # (12, D_MODEL)
    # fixed sinusoidal positional embedding, pre-tiled over batch
    pos = jnp.arange(L, dtype=jnp.float32)[:, None]
    div = jnp.exp(jnp.arange(0, D_MODEL, 2, dtype=jnp.float32)
                  * (-(math.log(10000.0) / D_MODEL)))
    pe = jnp.zeros((L, D_MODEL), jnp.float32)
    pe = pe.at[:, 0::2].set(jnp.sin(pos * div))
    pe = pe.at[:, 1::2].set(jnp.cos(pos * div))
    p['pe'] = jnp.tile(pe, (B, 1))                                               # (B*L, D_MODEL)
    # Mamba in_proj (2*D_INNER, D_MODEL), no bias -> single fused transposed weight
    w_in = rnd(ks[1], (2 * D_INNER, D_MODEL))
    p['win'] = w_in.T                                                            # (D_MODEL, 128)
    # depthwise conv1d (D_INNER, 1, D_CONV) + bias
    w_c = rnd(ks[2], (D_INNER, 1, D_CONV))
    convw = jnp.transpose(w_c[:, 0, :], (1, 0))                                  # (D_CONV, D_INNER)
    convb = rnd(ks[3], (1, D_INNER))
    # x_proj (DT_RANK + 2*D_STATE, D_INNER), no bias -> fused, columns [B | C | dt]
    w_x = rnd(ks[4], (DT_RANK + 2 * D_STATE, D_INNER))
    p['wx'] = jnp.concatenate([w_x[DT_RANK:DT_RANK + D_STATE].T,
                               w_x[DT_RANK + D_STATE:].T,
                               w_x[:DT_RANK].T], axis=1)                         # (D_INNER, 18)
    # dt_proj (D_INNER, DT_RANK) + bias
    wdt = rnd(ks[5], (D_INNER, DT_RANK)).T                                       # (DT_RANK, D_INNER)
    bdt = rnd(ks[6], (1, D_INNER))
    # A_log = log(arange(1..D_STATE)) repeated over channels, D = 1
    a = jnp.arange(1, D_STATE + 1, dtype=jnp.float32)
    alog = jnp.log(jnp.broadcast_to(a[:, None], (D_STATE, D_INNER)))
    dvec = jnp.ones((1, D_INNER), jnp.float32)
    # pack all the D_INNER-lane small params into one ref:
    # rows [0:8]=alog, [8:12]=convw, [12:14]=wdt, [14]=convb, [15]=bdt, [16]=dvec
    p['packa'] = jnp.concatenate([alog, convw, wdt, convb, bdt, dvec], axis=0)   # (17, D_INNER)
    # out_proj (D_MODEL, D_INNER), no bias
    p['wout'] = rnd(ks[7], (D_MODEL, D_INNER)).T                                 # (D_INNER, D_MODEL)
    # projection Linear(D_MODEL, C_OUT) with bias, packed
    wproj = rnd(ks[8], (C_OUT, D_MODEL)).T                                       # (D_MODEL, C_OUT)
    bproj = rnd(ks[9], (1, C_OUT))
    p['wprojb'] = jnp.concatenate([wproj, bproj], axis=0)                        # (D_MODEL+1, C_OUT)
    # out_layer Linear(seq_len, pred_len) with bias, packed
    wol = rnd(ks[10], (PRED, L))
    bol = rnd(ks[11], (PRED, 1))
    p['wolb'] = jnp.concatenate([wol, bol], axis=1)                              # (PRED, L+1)
    return p


def mamba_forecast(x_enc, p):
    def full(shape):
        n = len(shape)
        return pl.BlockSpec(shape, lambda i, _n=n: (0,) * _n)

    in_specs = [
        full((B, L, ENC_IN)),                       # x_enc
        full((BL, D_MODEL)),                        # pe (pre-tiled)
        full((3 * ENC_IN, D_MODEL)),                # wemb (fused taps)
        full((D_MODEL, 2 * D_INNER)),               # win (fused in_proj)
        full((D_INNER, DT_RANK + 2 * D_STATE)),     # wx (fused x_proj)
        full((D_STATE + D_CONV + DT_RANK + 3, D_INNER)),  # packa
        full((D_INNER, D_MODEL)),                   # wout
        full((D_MODEL + 1, C_OUT)),                 # wproj + bproj
        full((PRED, L + 1)),                        # wol + bol
    ]
    out_specs = full((B, PRED, C_OUT))

    return pl.pallas_call(
        mamba_forecast_kernel,
        out_shape=jax.ShapeDtypeStruct((B, PRED, C_OUT), jnp.float32),
        grid_spec=pltpu.PrefetchScalarGridSpec(
            num_scalar_prefetch=0,
            grid=(1,),                               # single step: both batches at once
            in_specs=in_specs,
            out_specs=out_specs,
        ),
        compiler_params=pltpu.CompilerParams(dimension_semantics=("arbitrary",)),
    )(x_enc, p['pe'], p['wemb'], p['win'], p['wx'], p['packa'],
      p['wout'], p['wprojb'], p['wolb'])


if __name__ == "__main__":
    key = jax.random.PRNGKey(0)
    kx, kp = jax.random.split(key)
    # x_mark_enc / x_dec / x_mark_dec are unused by the forecast path (x_mark=None)
    x_enc = jax.random.normal(kx, (B, L, ENC_IN), jnp.float32)
    params = build_params(kp)
    out = mamba_forecast(x_enc, params)
    jax.block_until_ready(out)
    assert out.shape == (B, PRED, C_OUT) and out.dtype == jnp.float32
    print("KERNEL_OK")
</pallas_src>

<mosaic_0001>
module attributes {stable_mosaic.version = 11 : i64} {
  func.func @mamba_forecast_kernel(%arg0: i32, %arg1: memref<2x8x4xf32, #tpu.memory_space<vmem>>, %arg2: memref<16x32xf32, #tpu.memory_space<vmem>>, %arg3: memref<12x32xf32, #tpu.memory_space<vmem>>, %arg4: memref<32x128xf32, #tpu.memory_space<vmem>>, %arg5: memref<64x18xf32, #tpu.memory_space<vmem>>, %arg6: memref<17x64xf32, #tpu.memory_space<vmem>>, %arg7: memref<64x32xf32, #tpu.memory_space<vmem>>, %arg8: memref<33x4xf32, #tpu.memory_space<vmem>>, %arg9: memref<4x9xf32, #tpu.memory_space<vmem>>, %arg10: memref<2x4x4xf32, #tpu.memory_space<vmem>>) attributes {dimension_semantics = [#tpu.dimension_semantics<arbitrary>], iteration_bounds = array<i64: 1>, scalar_prefetch = 0 : i64, scratch_operands = 0 : i64, tpu.core_type = #tpu.core_type<tc>, window_params = [{pipeline_mode = #tpu.pipeline_mode<synchronous>, transform_indices = @transform_0, window_bounds = array<i64: 2, 8, 4>}, {pipeline_mode = #tpu.pipeline_mode<synchronous>, transform_indices = @transform_1, window_bounds = array<i64: 16, 32>}, {pipeline_mode = #tpu.pipeline_mode<synchronous>, transform_indices = @transform_2, window_bounds = array<i64: 12, 32>}, {pipeline_mode = #tpu.pipeline_mode<synchronous>, transform_indices = @transform_3, window_bounds = array<i64: 32, 128>}, {pipeline_mode = #tpu.pipeline_mode<synchronous>, transform_indices = @transform_4, window_bounds = array<i64: 64, 18>}, {pipeline_mode = #tpu.pipeline_mode<synchronous>, transform_indices = @transform_5, window_bounds = array<i64: 17, 64>}, {pipeline_mode = #tpu.pipeline_mode<synchronous>, transform_indices = @transform_6, window_bounds = array<i64: 64, 32>}, {pipeline_mode = #tpu.pipeline_mode<synchronous>, transform_indices = @transform_7, window_bounds = array<i64: 33, 4>}, {pipeline_mode = #tpu.pipeline_mode<synchronous>, transform_indices = @transform_8, window_bounds = array<i64: 4, 9>}, {pipeline_mode = #tpu.pipeline_mode<synchronous>, transform_indices = @transform_9, window_bounds = array<i64: 2, 4, 4>}]} {
    %c0 = arith.constant 0 : index
    %c0_0 = arith.constant 0 : index
    %0 = vector.load %arg6[%c0, %c0_0] : memref<17x64xf32, #tpu.memory_space<vmem>>, vector<8x64xf32>
    %c8 = arith.constant 8 : index
    %c0_1 = arith.constant 0 : index
    %1 = vector.load %arg6[%c8, %c0_1] : memref<17x64xf32, #tpu.memory_space<vmem>>, vector<4x64xf32>
    %c12 = arith.constant 12 : index
    %c0_2 = arith.constant 0 : index
    %2 = vector.load %arg6[%c12, %c0_2] : memref<17x64xf32, #tpu.memory_space<vmem>>, vector<2x64xf32>
    %c14 = arith.constant 14 : index
    %c0_3 = arith.constant 0 : index
    %3 = vector.load %arg6[%c14, %c0_3] : memref<17x64xf32, #tpu.memory_space<vmem>>, vector<1x64xf32>
    %c15 = arith.constant 15 : index
    %c0_4 = arith.constant 0 : index
    %4 = vector.load %arg6[%c15, %c0_4] : memref<17x64xf32, #tpu.memory_space<vmem>>, vector<1x64xf32>
    %c16 = arith.constant 16 : index
    %c0_5 = arith.constant 0 : index
    %5 = vector.load %arg6[%c16, %c0_5] : memref<17x64xf32, #tpu.memory_space<vmem>>, vector<1x64xf32>
    %c0_6 = arith.constant 0 : index
    %c0_7 = arith.constant 0 : index
    %c0_8 = arith.constant 0 : index
    %6 = vector.load %arg1[%c0_6, %c0_7, %c0_8] : memref<2x8x4xf32, #tpu.memory_space<vmem>>, vector<1x8x4xf32>
    %7 = vector.shape_cast %6 : vector<1x8x4xf32> to vector<8x4xf32>
    %cst = arith.constant dense<0.000000e+00> : vector<4xf32>
    %8 = vector.multi_reduction <add>, %7, %cst [0] : vector<8x4xf32> to vector<4xf32>
    %9 = vector.shape_cast %8 : vector<4xf32> to vector<1x4xf32>
    %cst_9 = arith.constant 8.000000e+00 : f32
    %10 = vector.broadcast %cst_9 : f32 to vector<1x4xf32>
    %11 = arith.divf %9, %10 : vector<1x4xf32>
    %12 = vector.broadcast %11 : vector<1x4xf32> to vector<8x4xf32>
    %13 = arith.subf %7, %12 : vector<8x4xf32>
    %14 = arith.mulf %13, %13 : vector<8x4xf32>
    %cst_10 = arith.constant dense<0.000000e+00> : vector<4xf32>
    %15 = vector.multi_reduction <add>, %14, %cst_10 [0] : vector<8x4xf32> to vector<4xf32>
    %16 = vector.shape_cast %15 : vector<4xf32> to vector<1x4xf32>
    %cst_11 = arith.constant 8.000000e+00 : f32
    %17 = vector.broadcast %cst_11 : f32 to vector<1x4xf32>
    %18 = arith.divf %16, %17 : vector<1x4xf32>
    %cst_12 = arith.constant 9.99999974E-6 : f32
    %19 = vector.broadcast %cst_12 : f32 to vector<1x4xf32>
    %20 = arith.addf %18, %19 : vector<1x4xf32>
    %21 = math.sqrt %20 : vector<1x4xf32>
    %22 = vector.broadcast %21 : vector<1x4xf32> to vector<8x4xf32>
    %23 = arith.divf %13, %22 : vector<8x4xf32>
    %24 = vector.extract_strided_slice %23 {offsets = [7, 0], sizes = [1, 4], strides = [1, 1]} : vector<8x4xf32> to vector<1x4xf32>
    %25 = vector.extract_strided_slice %23 {offsets = [0, 0], sizes = [7, 4], strides = [1, 1]} : vector<8x4xf32> to vector<7x4xf32>
    %26 = tpu.concatenate %24, %25 in 0 : vector<1x4xf32>, vector<7x4xf32> -> vector<8x4xf32>
    %27 = vector.extract_strided_slice %23 {offsets = [1, 0], sizes = [7, 4], strides = [1, 1]} : vector<8x4xf32> to vector<7x4xf32>
    %28 = vector.extract_strided_slice %23 {offsets = [0, 0], sizes = [1, 4], strides = [1, 1]} : vector<8x4xf32> to vector<1x4xf32>
    %29 = tpu.concatenate %27, %28 in 0 : vector<7x4xf32>, vector<1x4xf32> -> vector<8x4xf32>
    %30 = tpu.concatenate %26, %23, %29 in 1 : vector<8x4xf32>, vector<8x4xf32>, vector<8x4xf32> -> vector<8x12xf32>
    %c1 = arith.constant 1 : index
    %c0_13 = arith.constant 0 : index
    %c0_14 = arith.constant 0 : index
    %31 = vector.load %arg1[%c1, %c0_13, %c0_14] : memref<2x8x4xf32, #tpu.memory_space<vmem>>, vector<1x8x4xf32>
    %32 = vector.shape_cast %31 : vector<1x8x4xf32> to vector<8x4xf32>
    %cst_15 = arith.constant dense<0.000000e+00> : vector<4xf32>
    %33 = vector.multi_reduction <add>, %32, %cst_15 [0] : vector<8x4xf32> to vector<4xf32>
    %34 = vector.shape_cast %33 : vector<4xf32> to vector<1x4xf32>
    %cst_16 = arith.constant 8.000000e+00 : f32
    %35 = vector.broadcast %cst_16 : f32 to vector<1x4xf32>
    %36 = arith.divf %34, %35 : vector<1x4xf32>
    %37 = vector.broadcast %36 : vector<1x4xf32> to vector<8x4xf32>
    %38 = arith.subf %32, %37 : vector<8x4xf32>
    %39 = arith.mulf %38, %38 : vector<8x4xf32>
    %cst_17 = arith.constant dense<0.000000e+00> : vector<4xf32>
    %40 = vector.multi_reduction <add>, %39, %cst_17 [0] : vector<8x4xf32> to vector<4xf32>
    %41 = vector.shape_cast %40 : vector<4xf32> to vector<1x4xf32>
    %cst_18 = arith.constant 8.000000e+00 : f32
    %42 = vector.broadcast %cst_18 : f32 to vector<1x4xf32>
    %43 = arith.divf %41, %42 : vector<1x4xf32>
    %cst_19 = arith.constant 9.99999974E-6 : f32
    %44 = vector.broadcast %cst_19 : f32 to vector<1x4xf32>
    %45 = arith.addf %43, %44 : vector<1x4xf32>
    %46 = math.sqrt %45 : vector<1x4xf32>
    %47 = vector.broadcast %46 : vector<1x4xf32> to vector<8x4xf32>
    %48 = arith.divf %38, %47 : vector<8x4xf32>
    %49 = vector.extract_strided_slice %48 {offsets = [7, 0], sizes = [1, 4], strides = [1, 1]} : vector<8x4xf32> to vector<1x4xf32>
    %50 = vector.extract_strided_slice %48 {offsets = [0, 0], sizes = [7, 4], strides = [1, 1]} : vector<8x4xf32> to vector<7x4xf32>
    %51 = tpu.concatenate %49, %50 in 0 : vector<1x4xf32>, vector<7x4xf32> -> vector<8x4xf32>
    %52 = vector.extract_strided_slice %48 {offsets = [1, 0], sizes = [7, 4], strides = [1, 1]} : vector<8x4xf32> to vector<7x4xf32>
    %53 = vector.extract_strided_slice %48 {offsets = [0, 0], sizes = [1, 4], strides = [1, 1]} : vector<8x4xf32> to vector<1x4xf32>
    %54 = tpu.concatenate %52, %53 in 0 : vector<7x4xf32>, vector<1x4xf32> -> vector<8x4xf32>
    %55 = tpu.concatenate %51, %48, %54 in 1 : vector<8x4xf32>, vector<8x4xf32>, vector<8x4xf32> -> vector<8x12xf32>
    %56 = tpu.concatenate %30, %55 in 0 : vector<8x12xf32>, vector<8x12xf32> -> vector<16x12xf32>
    %c0_20 = arith.constant 0 : index
    %c0_21 = arith.constant 0 : index
    %57 = vector.load %arg3[%c0_20, %c0_21] : memref<12x32xf32, #tpu.memory_space<vmem>>, vector<12x32xf32>
    %cst_22 = arith.constant dense<0.000000e+00> : vector<16x32xf32>
    %58 = tpu.matmul %56, %57, %cst_22 {dimension_numbers = #tpu.dot_dimension_numbers<[1], [0], [0], [1], [0, 0, 1, 1], [], []>} : vector<16x12xf32>, vector<12x32xf32>, vector<16x32xf32> -> vector<16x32xf32>
    %c0_23 = arith.constant 0 : index
    %c0_24 = arith.constant 0 : index
    %59 = vector.load %arg2[%c0_23, %c0_24] : memref<16x32xf32, #tpu.memory_space<vmem>>, vector<16x32xf32>
    %60 = arith.addf %58, %59 : vector<16x32xf32>
    %c0_25 = arith.constant 0 : index
    %c0_26 = arith.constant 0 : index
    %61 = vector.load %arg4[%c0_25, %c0_26] : memref<32x128xf32, #tpu.memory_space<vmem>>, vector<32x128xf32>
    %cst_27 = arith.constant dense<0.000000e+00> : vector<16x128xf32>
    %62 = tpu.matmul %60, %61, %cst_27 {dimension_numbers = #tpu.dot_dimension_numbers<[1], [0], [0], [1], [0, 0, 1, 1], [], []>} : vector<16x32xf32>, vector<32x128xf32>, vector<16x128xf32> -> vector<16x128xf32>
    %63 = vector.extract_strided_slice %62 {offsets = [0, 0], sizes = [16, 64], strides = [1, 1]} : vector<16x128xf32> to vector<16x64xf32>
    %64 = vector.extract_strided_slice %62 {offsets = [0, 64], sizes = [16, 64], strides = [1, 1]} : vector<16x128xf32> to vector<16x64xf32>
    %65 = tpu.iota {dimensions = array<i32: 0>} : vector<16x1xi32>
    %c8_i32 = arith.constant 8 : i32
    %c0_i32 = arith.constant 0 : i32
    %66 = arith.cmpi eq, %c8_i32, %c0_i32 : i32
    %c1_i32 = arith.constant 1 : i32
    %67 = arith.select %66, %c1_i32, %c8_i32 : i32
    %68 = vector.broadcast %67 : i32 to vector<16x1xi32>
    %69 = arith.remsi %65, %68 : vector<16x1xi32>
    %c0_i32_28 = arith.constant 0 : i32
    %70 = vector.broadcast %c0_i32_28 : i32 to vector<16x1xi32>
    %71 = arith.cmpi ne, %69, %70 : vector<16x1xi32>
    %c0_i32_29 = arith.constant 0 : i32
    %72 = vector.broadcast %c0_i32_29 : i32 to vector<16x1xi32>
    %73 = arith.cmpi slt, %69, %72 : vector<16x1xi32>
    %c0_i32_30 = arith.constant 0 : i32
    %74 = arith.cmpi slt, %67, %c0_i32_30 : i32
    %75 = vector.broadcast %74 : i1 to vector<16x1xi1>
    %76 = vector.broadcast %75 : vector<16x1xi1> to vector<16x1xi1>
    %77 = arith.xori %73, %76 : vector<16x1xi1>
    %78 = arith.andi %77, %71 : vector<16x1xi1>
    %79 = vector.broadcast %67 : i32 to vector<16x1xi32>
    %80 = arith.addi %69, %79 : vector<16x1xi32>
    %81 = arith.select %78, %80, %69 : vector<16x1xi1>, vector<16x1xi32>
    %cst_31 = arith.constant 0.000000e+00 : f32
    %82 = vector.broadcast %cst_31 : f32 to vector<3x64xf32>
    %83 = tpu.concatenate %82, %63 in 0 : vector<3x64xf32>, vector<16x64xf32> -> vector<19x64xf32>
    %84 = vector.shape_cast %3 : vector<1x64xf32> to vector<1x64xf32>
    %85 = vector.broadcast %84 : vector<1x64xf32> to vector<16x64xf32>
    %86 = vector.extract_strided_slice %83 {offsets = [0, 0], sizes = [16, 64], strides = [1, 1]} : vector<19x64xf32> to vector<16x64xf32>
    %c3_i32 = arith.constant 3 : i32
    %87 = vector.broadcast %c3_i32 : i32 to vector<16x1xi32>
    %88 = arith.cmpi sge, %81, %87 : vector<16x1xi32>
    %cst_32 = arith.constant 0.000000e+00 : f32
    %89 = vector.shape_cast %88 : vector<16x1xi1> to vector<16x1xi1>
    %90 = vector.broadcast %89 : vector<16x1xi1> to vector<16x64xi1>
    %91 = vector.broadcast %cst_32 : f32 to vector<16x64xf32>
    %92 = arith.select %90, %86, %91 : vector<16x64xi1>, vector<16x64xf32>
    %93 = vector.extract_strided_slice %1 {offsets = [0, 0], sizes = [1, 64], strides = [1, 1]} : vector<4x64xf32> to vector<1x64xf32>
    %94 = vector.broadcast %93 : vector<1x64xf32> to vector<16x64xf32>
    %95 = arith.mulf %92, %94 : vector<16x64xf32>
    %96 = arith.addf %85, %95 : vector<16x64xf32>
    %97 = vector.extract_strided_slice %83 {offsets = [1, 0], sizes = [16, 64], strides = [1, 1]} : vector<19x64xf32> to vector<16x64xf32>
    %c2_i32 = arith.constant 2 : i32
    %98 = vector.broadcast %c2_i32 : i32 to vector<16x1xi32>
    %99 = arith.cmpi sge, %81, %98 : vector<16x1xi32>
    %cst_33 = arith.constant 0.000000e+00 : f32
    %100 = vector.shape_cast %99 : vector<16x1xi1> to vector<16x1xi1>
    %101 = vector.broadcast %100 : vector<16x1xi1> to vector<16x64xi1>
    %102 = vector.broadcast %cst_33 : f32 to vector<16x64xf32>
    %103 = arith.select %101, %97, %102 : vector<16x64xi1>, vector<16x64xf32>
    %104 = vector.extract_strided_slice %1 {offsets = [1, 0], sizes = [1, 64], strides = [1, 1]} : vector<4x64xf32> to vector<1x64xf32>
    %105 = vector.broadcast %104 : vector<1x64xf32> to vector<16x64xf32>
    %106 = arith.mulf %103, %105 : vector<16x64xf32>
    %107 = arith.addf %96, %106 : vector<16x64xf32>
    %108 = vector.extract_strided_slice %83 {offsets = [2, 0], sizes = [16, 64], strides = [1, 1]} : vector<19x64xf32> to vector<16x64xf32>
    %c1_i32_34 = arith.constant 1 : i32
    %109 = vector.broadcast %c1_i32_34 : i32 to vector<16x1xi32>
    %110 = arith.cmpi sge, %81, %109 : vector<16x1xi32>
    %cst_35 = arith.constant 0.000000e+00 : f32
    %111 = vector.shape_cast %110 : vector<16x1xi1> to vector<16x1xi1>
    %112 = vector.broadcast %111 : vector<16x1xi1> to vector<16x64xi1>
    %113 = vector.broadcast %cst_35 : f32 to vector<16x64xf32>
    %114 = arith.select %112, %108, %113 : vector<16x64xi1>, vector<16x64xf32>
    %115 = vector.extract_strided_slice %1 {offsets = [2, 0], sizes = [1, 64], strides = [1, 1]} : vector<4x64xf32> to vector<1x64xf32>
    %116 = vector.broadcast %115 : vector<1x64xf32> to vector<16x64xf32>
    %117 = arith.mulf %114, %116 : vector<16x64xf32>
    %118 = arith.addf %107, %117 : vector<16x64xf32>
    %119 = vector.extract_strided_slice %83 {offsets = [3, 0], sizes = [16, 64], strides = [1, 1]} : vector<19x64xf32> to vector<16x64xf32>
    %120 = vector.extract_strided_slice %1 {offsets = [3, 0], sizes = [1, 64], strides = [1, 1]} : vector<4x64xf32> to vector<1x64xf32>
    %121 = vector.broadcast %120 : vector<1x64xf32> to vector<16x64xf32>
    %122 = arith.mulf %119, %121 : vector<16x64xf32>
    %123 = arith.addf %118, %122 : vector<16x64xf32>
    %cst_36 = arith.constant 0.000000e+00 : f32
    %124 = vector.broadcast %cst_36 : f32 to vector<16x64xf32>
    %125 = arith.subf %124, %123 : vector<16x64xf32>
    %126 = math.exp %125 : vector<16x64xf32>
    %cst_37 = arith.constant 1.000000e+00 : f32
    %127 = vector.broadcast %cst_37 : f32 to vector<16x64xf32>
    %128 = arith.addf %127, %126 : vector<16x64xf32>
    %cst_38 = arith.constant 1.000000e+00 : f32
    %129 = vector.broadcast %cst_38 : f32 to vector<16x64xf32>
    %130 = arith.divf %129, %128 : vector<16x64xf32>
    %131 = arith.mulf %123, %130 : vector<16x64xf32>
    %c0_39 = arith.constant 0 : index
    %c0_40 = arith.constant 0 : index
    %132 = vector.load %arg5[%c0_39, %c0_40] : memref<64x18xf32, #tpu.memory_space<vmem>>, vector<64x18xf32>
    %cst_41 = arith.constant dense<0.000000e+00> : vector<16x18xf32>
    %133 = tpu.matmul %131, %132, %cst_41 {dimension_numbers = #tpu.dot_dimension_numbers<[1], [0], [0], [1], [0, 0, 1, 1], [], []>} : vector<16x64xf32>, vector<64x18xf32>, vector<16x18xf32> -> vector<16x18xf32>
    %134 = vector.extract_strided_slice %133 {offsets = [0, 0], sizes = [16, 8], strides = [1, 1]} : vector<16x18xf32> to vector<16x8xf32>
    %135 = vector.extract_strided_slice %133 {offsets = [0, 8], sizes = [16, 8], strides = [1, 1]} : vector<16x18xf32> to vector<16x8xf32>
    %136 = vector.extract_strided_slice %133 {offsets = [0, 16], sizes = [16, 2], strides = [1, 1]} : vector<16x18xf32> to vector<16x2xf32>
    %cst_42 = arith.constant dense<0.000000e+00> : vector<16x64xf32>
    %137 = tpu.matmul %136, %2, %cst_42 {dimension_numbers = #tpu.dot_dimension_numbers<[1], [0], [0], [1], [0, 0, 1, 1], [], []>} : vector<16x2xf32>, vector<2x64xf32>, vector<16x64xf32> -> vector<16x64xf32>
    %138 = vector.broadcast %4 : vector<1x64xf32> to vector<16x64xf32>
    %139 = arith.addf %137, %138 : vector<16x64xf32>
    %cst_43 = arith.constant 0.000000e+00 : f32
    %140 = vector.broadcast %cst_43 : f32 to vector<16x64xf32>
    %141 = arith.maximumf %139, %140 : vector<16x64xf32>
    %142 = math.absf %139 : vector<16x64xf32>
    %cst_44 = arith.constant 0.000000e+00 : f32
    %143 = vector.broadcast %cst_44 : f32 to vector<16x64xf32>
    %144 = arith.subf %143, %142 : vector<16x64xf32>
    %145 = math.exp %144 : vector<16x64xf32>
    %cst_45 = arith.constant 1.000000e+00 : f32
    %146 = vector.broadcast %cst_45 : f32 to vector<16x64xf32>
    %147 = arith.addf %146, %145 : vector<16x64xf32>
    %148 = math.log %147 : vector<16x64xf32>
    %149 = arith.addf %141, %148 : vector<16x64xf32>
    %150 = math.exp %0 : vector<8x64xf32>
    %cst_46 = arith.constant 0.000000e+00 : f32
    %151 = vector.broadcast %cst_46 : f32 to vector<8x64xf32>
    %152 = arith.subf %151, %150 : vector<8x64xf32>
    %153 = vector.extract_strided_slice %149 {offsets = [0, 0], sizes = [8, 64], strides = [1, 1]} : vector<16x64xf32> to vector<8x64xf32>
    %154 = vector.extract_strided_slice %131 {offsets = [0, 0], sizes = [8, 64], strides = [1, 1]} : vector<16x64xf32> to vector<8x64xf32>
    %155 = vector.shape_cast %153 : vector<8x64xf32> to vector<8x1x64xf32>
    %156 = vector.shape_cast %152 : vector<8x64xf32> to vector<1x8x64xf32>
    %157 = vector.broadcast %155 : vector<8x1x64xf32> to vector<8x8x64xf32>
    %158 = vector.broadcast %156 : vector<1x8x64xf32> to vector<8x8x64xf32>
    %159 = arith.mulf %157, %158 : vector<8x8x64xf32>
    %160 = math.exp %159 : vector<8x8x64xf32>
    %161 = vector.extract_strided_slice %134 {offsets = [0, 0], sizes = [8, 8], strides = [1, 1]} : vector<16x8xf32> to vector<8x8xf32>
    %162 = vector.shape_cast %161 : vector<8x8xf32> to vector<8x8x1xf32>
    %163 = arith.mulf %153, %154 : vector<8x64xf32>
    %164 = vector.shape_cast %163 : vector<8x64xf32> to vector<8x1x64xf32>
    %165 = vector.broadcast %162 : vector<8x8x1xf32> to vector<8x8x64xf32>
    %166 = vector.broadcast %164 : vector<8x1x64xf32> to vector<8x8x64xf32>
    %167 = arith.mulf %165, %166 : vector<8x8x64xf32>
    %168 = vector.extract_strided_slice %135 {offsets = [0, 0], sizes = [8, 8], strides = [1, 1]} : vector<16x8xf32> to vector<8x8xf32>
    %169 = vector.shape_cast %168 : vector<8x8xf32> to vector<8x8x1xf32>
    %cst_47 = arith.constant 0.000000e+00 : f32
    %170 = vector.broadcast %cst_47 : f32 to vector<8x64xf32>
    %171 = vector.extract_strided_slice %160 {offsets = [0, 0, 0], sizes = [1, 8, 64], strides = [1, 1, 1]} : vector<8x8x64xf32> to vector<1x8x64xf32>
    %172 = vector.shape_cast %171 : vector<1x8x64xf32> to vector<8x64xf32>
    %173 = arith.mulf %172, %170 : vector<8x64xf32>
    %174 = vector.extract_strided_slice %167 {offsets = [0, 0, 0], sizes = [1, 8, 64], strides = [1, 1, 1]} : vector<8x8x64xf32> to vector<1x8x64xf32>
    %175 = vector.shape_cast %174 : vector<1x8x64xf32> to vector<8x64xf32>
    %176 = arith.addf %173, %175 : vector<8x64xf32>
    %177 = vector.extract_strided_slice %169 {offsets = [0, 0, 0], sizes = [1, 8, 1], strides = [1, 1, 1]} : vector<8x8x1xf32> to vector<1x8x1xf32>
    %178 = vector.shape_cast %177 : vector<1x8x1xf32> to vector<8x1xf32>
    %179 = vector.broadcast %178 : vector<8x1xf32> to vector<8x64xf32>
    %180 = arith.mulf %179, %176 : vector<8x64xf32>
    %cst_48 = arith.constant dense<0.000000e+00> : vector<64xf32>
    %181 = vector.multi_reduction <add>, %180, %cst_48 [0] : vector<8x64xf32> to vector<64xf32>
    %182 = vector.shape_cast %181 : vector<64xf32> to vector<1x64xf32>
    %183 = vector.extract_strided_slice %160 {offsets = [1, 0, 0], sizes = [1, 8, 64], strides = [1, 1, 1]} : vector<8x8x64xf32> to vector<1x8x64xf32>
    %184 = vector.shape_cast %183 : vector<1x8x64xf32> to vector<8x64xf32>
    %185 = arith.mulf %184, %176 : vector<8x64xf32>
    %186 = vector.extract_strided_slice %167 {offsets = [1, 0, 0], sizes = [1, 8, 64], strides = [1, 1, 1]} : vector<8x8x64xf32> to vector<1x8x64xf32>
    %187 = vector.shape_cast %186 : vector<1x8x64xf32> to vector<8x64xf32>
    %188 = arith.addf %185, %187 : vector<8x64xf32>
    %189 = vector.extract_strided_slice %169 {offsets = [1, 0, 0], sizes = [1, 8, 1], strides = [1, 1, 1]} : vector<8x8x1xf32> to vector<1x8x1xf32>
    %190 = vector.shape_cast %189 : vector<1x8x1xf32> to vector<8x1xf32>
    %191 = vector.broadcast %190 : vector<8x1xf32> to vector<8x64xf32>
    %192 = arith.mulf %191, %188 : vector<8x64xf32>
    %cst_49 = arith.constant dense<0.000000e+00> : vector<64xf32>
    %193 = vector.multi_reduction <add>, %192, %cst_49 [0] : vector<8x64xf32> to vector<64xf32>
    %194 = vector.shape_cast %193 : vector<64xf32> to vector<1x64xf32>
    %195 = vector.extract_strided_slice %160 {offsets = [2, 0, 0], sizes = [1, 8, 64], strides = [1, 1, 1]} : vector<8x8x64xf32> to vector<1x8x64xf32>
    %196 = vector.shape_cast %195 : vector<1x8x64xf32> to vector<8x64xf32>
    %197 = arith.mulf %196, %188 : vector<8x64xf32>
    %198 = vector.extract_strided_slice %167 {offsets = [2, 0, 0], sizes = [1, 8, 64], strides = [1, 1, 1]} : vector<8x8x64xf32> to vector<1x8x64xf32>
    %199 = vector.shape_cast %198 : vector<1x8x64xf32> to vector<8x64xf32>
    %200 = arith.addf %197, %199 : vector<8x64xf32>
    %201 = vector.extract_strided_slice %169 {offsets = [2, 0, 0], sizes = [1, 8, 1], strides = [1, 1, 1]} : vector<8x8x1xf32> to vector<1x8x1xf32>
    %202 = vector.shape_cast %201 : vector<1x8x1xf32> to vector<8x1xf32>
    %203 = vector.broadcast %202 : vector<8x1xf32> to vector<8x64xf32>
    %204 = arith.mulf %203, %200 : vector<8x64xf32>
    %cst_50 = arith.constant dense<0.000000e+00> : vector<64xf32>
    %205 = vector.multi_reduction <add>, %204, %cst_50 [0] : vector<8x64xf32> to vector<64xf32>
    %206 = vector.shape_cast %205 : vector<64xf32> to vector<1x64xf32>
    %207 = vector.extract_strided_slice %160 {offsets = [3, 0, 0], sizes = [1, 8, 64], strides = [1, 1, 1]} : vector<8x8x64xf32> to vector<1x8x64xf32>
    %208 = vector.shape_cast %207 : vector<1x8x64xf32> to vector<8x64xf32>
    %209 = arith.mulf %208, %200 : vector<8x64xf32>
    %210 = vector.extract_strided_slice %167 {offsets = [3, 0, 0], sizes = [1, 8, 64], strides = [1, 1, 1]} : vector<8x8x64xf32> to vector<1x8x64xf32>
    %211 = vector.shape_cast %210 : vector<1x8x64xf32> to vector<8x64xf32>
    %212 = arith.addf %209, %211 : vector<8x64xf32>
    %213 = vector.extract_strided_slice %169 {offsets = [3, 0, 0], sizes = [1, 8, 1], strides = [1, 1, 1]} : vector<8x8x1xf32> to vector<1x8x1xf32>
    %214 = vector.shape_cast %213 : vector<1x8x1xf32> to vector<8x1xf32>
    %215 = vector.broadcast %214 : vector<8x1xf32> to vector<8x64xf32>
    %216 = arith.mulf %215, %212 : vector<8x64xf32>
    %cst_51 = arith.constant dense<0.000000e+00> : vector<64xf32>
    %217 = vector.multi_reduction <add>, %216, %cst_51 [0] : vector<8x64xf32> to vector<64xf32>
    %218 = vector.shape_cast %217 : vector<64xf32> to vector<1x64xf32>
    %219 = vector.extract_strided_slice %160 {offsets = [4, 0, 0], sizes = [1, 8, 64], strides = [1, 1, 1]} : vector<8x8x64xf32> to vector<1x8x64xf32>
    %220 = vector.shape_cast %219 : vector<1x8x64xf32> to vector<8x64xf32>
    %221 = arith.mulf %220, %212 : vector<8x64xf32>
    %222 = vector.extract_strided_slice %167 {offsets = [4, 0, 0], sizes = [1, 8, 64], strides = [1, 1, 1]} : vector<8x8x64xf32> to vector<1x8x64xf32>
    %223 = vector.shape_cast %222 : vector<1x8x64xf32> to vector<8x64xf32>
    %224 = arith.addf %221, %223 : vector<8x64xf32>
    %225 = vector.extract_strided_slice %169 {offsets = [4, 0, 0], sizes = [1, 8, 1], strides = [1, 1, 1]} : vector<8x8x1xf32> to vector<1x8x1xf32>
    %226 = vector.shape_cast %225 : vector<1x8x1xf32> to vector<8x1xf32>
    %227 = vector.broadcast %226 : vector<8x1xf32> to vector<8x64xf32>
    %228 = arith.mulf %227, %224 : vector<8x64xf32>
    %cst_52 = arith.constant dense<0.000000e+00> : vector<64xf32>
    %229 = vector.multi_reduction <add>, %228, %cst_52 [0] : vector<8x64xf32> to vector<64xf32>
    %230 = vector.shape_cast %229 : vector<64xf32> to vector<1x64xf32>
    %231 = vector.extract_strided_slice %160 {offsets = [5, 0, 0], sizes = [1, 8, 64], strides = [1, 1, 1]} : vector<8x8x64xf32> to vector<1x8x64xf32>
    %232 = vector.shape_cast %231 : vector<1x8x64xf32> to vector<8x64xf32>
    %233 = arith.mulf %232, %224 : vector<8x64xf32>
    %234 = vector.extract_strided_slice %167 {offsets = [5, 0, 0], sizes = [1, 8, 64], strides = [1, 1, 1]} : vector<8x8x64xf32> to vector<1x8x64xf32>
    %235 = vector.shape_cast %234 : vector<1x8x64xf32> to vector<8x64xf32>
    %236 = arith.addf %233, %235 : vector<8x64xf32>
    %237 = vector.extract_strided_slice %169 {offsets = [5, 0, 0], sizes = [1, 8, 1], strides = [1, 1, 1]} : vector<8x8x1xf32> to vector<1x8x1xf32>
    %238 = vector.shape_cast %237 : vector<1x8x1xf32> to vector<8x1xf32>
    %239 = vector.broadcast %238 : vector<8x1xf32> to vector<8x64xf32>
    %240 = arith.mulf %239, %236 : vector<8x64xf32>
    %cst_53 = arith.constant dense<0.000000e+00> : vector<64xf32>
    %241 = vector.multi_reduction <add>, %240, %cst_53 [0] : vector<8x64xf32> to vector<64xf32>
    %242 = vector.shape_cast %241 : vector<64xf32> to vector<1x64xf32>
    %243 = vector.extract_strided_slice %160 {offsets = [6, 0, 0], sizes = [1, 8, 64], strides = [1, 1, 1]} : vector<8x8x64xf32> to vector<1x8x64xf32>
    %244 = vector.shape_cast %243 : vector<1x8x64xf32> to vector<8x64xf32>
    %245 = arith.mulf %244, %236 : vector<8x64xf32>
    %246 = vector.extract_strided_slice %167 {offsets = [6, 0, 0], sizes = [1, 8, 64], strides = [1, 1, 1]} : vector<8x8x64xf32> to vector<1x8x64xf32>
    %247 = vector.shape_cast %246 : vector<1x8x64xf32> to vector<8x64xf32>
    %248 = arith.addf %245, %247 : vector<8x64xf32>
    %249 = vector.extract_strided_slice %169 {offsets = [6, 0, 0], sizes = [1, 8, 1], strides = [1, 1, 1]} : vector<8x8x1xf32> to vector<1x8x1xf32>
    %250 = vector.shape_cast %249 : vector<1x8x1xf32> to vector<8x1xf32>
    %251 = vector.broadcast %250 : vector<8x1xf32> to vector<8x64xf32>
    %252 = arith.mulf %251, %248 : vector<8x64xf32>
    %cst_54 = arith.constant dense<0.000000e+00> : vector<64xf32>
    %253 = vector.multi_reduction <add>, %252, %cst_54 [0] : vector<8x64xf32> to vector<64xf32>
    %254 = vector.shape_cast %253 : vector<64xf32> to vector<1x64xf32>
    %255 = vector.extract_strided_slice %160 {offsets = [7, 0, 0], sizes = [1, 8, 64], strides = [1, 1, 1]} : vector<8x8x64xf32> to vector<1x8x64xf32>
    %256 = vector.shape_cast %255 : vector<1x8x64xf32> to vector<8x64xf32>
    %257 = arith.mulf %256, %248 : vector<8x64xf32>
    %258 = vector.extract_strided_slice %167 {offsets = [7, 0, 0], sizes = [1, 8, 64], strides = [1, 1, 1]} : vector<8x8x64xf32> to vector<1x8x64xf32>
    %259 = vector.shape_cast %258 : vector<1x8x64xf32> to vector<8x64xf32>
    %260 = arith.addf %257, %259 : vector<8x64xf32>
    %261 = vector.extract_strided_slice %169 {offsets = [7, 0, 0], sizes = [1, 8, 1], strides = [1, 1, 1]} : vector<8x8x1xf32> to vector<1x8x1xf32>
    %262 = vector.shape_cast %261 : vector<1x8x1xf32> to vector<8x1xf32>
    %263 = vector.broadcast %262 : vector<8x1xf32> to vector<8x64xf32>
    %264 = arith.mulf %263, %260 : vector<8x64xf32>
    %cst_55 = arith.constant dense<0.000000e+00> : vector<64xf32>
    %265 = vector.multi_reduction <add>, %264, %cst_55 [0] : vector<8x64xf32> to vector<64xf32>
    %266 = vector.shape_cast %265 : vector<64xf32> to vector<1x64xf32>
    %267 = tpu.concatenate %182, %194, %206, %218, %230, %242, %254, %266 in 0 : vector<1x64xf32>, vector<1x64xf32>, vector<1x64xf32>, vector<1x64xf32>, vector<1x64xf32>, vector<1x64xf32>, vector<1x64xf32>, vector<1x64xf32> -> vector<8x64xf32>
    %268 = vector.extract_strided_slice %149 {offsets = [8, 0], sizes = [8, 64], strides = [1, 1]} : vector<16x64xf32> to vector<8x64xf32>
    %269 = vector.extract_strided_slice %131 {offsets = [8, 0], sizes = [8, 64], strides = [1, 1]} : vector<16x64xf32> to vector<8x64xf32>
    %270 = vector.shape_cast %268 : vector<8x64xf32> to vector<8x1x64xf32>
    %271 = vector.shape_cast %152 : vector<8x64xf32> to vector<1x8x64xf32>
    %272 = vector.broadcast %270 : vector<8x1x64xf32> to vector<8x8x64xf32>
    %273 = vector.broadcast %271 : vector<1x8x64xf32> to vector<8x8x64xf32>
    %274 = arith.mulf %272, %273 : vector<8x8x64xf32>
    %275 = math.exp %274 : vector<8x8x64xf32>
    %276 = vector.extract_strided_slice %134 {offsets = [8, 0], sizes = [8, 8], strides = [1, 1]} : vector<16x8xf32> to vector<8x8xf32>
    %277 = vector.shape_cast %276 : vector<8x8xf32> to vector<8x8x1xf32>
    %278 = arith.mulf %268, %269 : vector<8x64xf32>
    %279 = vector.shape_cast %278 : vector<8x64xf32> to vector<8x1x64xf32>
    %280 = vector.broadcast %277 : vector<8x8x1xf32> to vector<8x8x64xf32>
    %281 = vector.broadcast %279 : vector<8x1x64xf32> to vector<8x8x64xf32>
    %282 = arith.mulf %280, %281 : vector<8x8x64xf32>
    %283 = vector.extract_strided_slice %135 {offsets = [8, 0], sizes = [8, 8], strides = [1, 1]} : vector<16x8xf32> to vector<8x8xf32>
    %284 = vector.shape_cast %283 : vector<8x8xf32> to vector<8x8x1xf32>
    %cst_56 = arith.constant 0.000000e+00 : f32
    %285 = vector.broadcast %cst_56 : f32 to vector<8x64xf32>
    %286 = vector.extract_strided_slice %275 {offsets = [0, 0, 0], sizes = [1, 8, 64], strides = [1, 1, 1]} : vector<8x8x64xf32> to vector<1x8x64xf32>
    %287 = vector.shape_cast %286 : vector<1x8x64xf32> to vector<8x64xf32>
    %288 = arith.mulf %287, %285 : vector<8x64xf32>
    %289 = vector.extract_strided_slice %282 {offsets = [0, 0, 0], sizes = [1, 8, 64], strides = [1, 1, 1]} : vector<8x8x64xf32> to vector<1x8x64xf32>
    %290 = vector.shape_cast %289 : vector<1x8x64xf32> to vector<8x64xf32>
    %291 = arith.addf %288, %290 : vector<8x64xf32>
    %292 = vector.extract_strided_slice %284 {offsets = [0, 0, 0], sizes = [1, 8, 1], strides = [1, 1, 1]} : vector<8x8x1xf32> to vector<1x8x1xf32>
    %293 = vector.shape_cast %292 : vector<1x8x1xf32> to vector<8x1xf32>
    %294 = vector.broadcast %293 : vector<8x1xf32> to vector<8x64xf32>
    %295 = arith.mulf %294, %291 : vector<8x64xf32>
    %cst_57 = arith.constant dense<0.000000e+00> : vector<64xf32>
    %296 = vector.multi_reduction <add>, %295, %cst_57 [0] : vector<8x64xf32> to vector<64xf32>
    %297 = vector.shape_cast %296 : vector<64xf32> to vector<1x64xf32>
    %298 = vector.extract_strided_slice %275 {offsets = [1, 0, 0], sizes = [1, 8, 64], strides = [1, 1, 1]} : vector<8x8x64xf32> to vector<1x8x64xf32>
    %299 = vector.shape_cast %298 : vector<1x8x64xf32> to vector<8x64xf32>
    %300 = arith.mulf %299, %291 : vector<8x64xf32>
    %301 = vector.extract_strided_slice %282 {offsets = [1, 0, 0], sizes = [1, 8, 64], strides = [1, 1, 1]} : vector<8x8x64xf32> to vector<1x8x64xf32>
    %302 = vector.shape_cast %301 : vector<1x8x64xf32> to vector<8x64xf32>
    %303 = arith.addf %300, %302 : vector<8x64xf32>
    %304 = vector.extract_strided_slice %284 {offsets = [1, 0, 0], sizes = [1, 8, 1], strides = [1, 1, 1]} : vector<8x8x1xf32> to vector<1x8x1xf32>
    %305 = vector.shape_cast %304 : vector<1x8x1xf32> to vector<8x1xf32>
    %306 = vector.broadcast %305 : vector<8x1xf32> to vector<8x64xf32>
    %307 = arith.mulf %306, %303 : vector<8x64xf32>
    %cst_58 = arith.constant dense<0.000000e+00> : vector<64xf32>
    %308 = vector.multi_reduction <add>, %307, %cst_58 [0] : vector<8x64xf32> to vector<64xf32>
    %309 = vector.shape_cast %308 : vector<64xf32> to vector<1x64xf32>
    %310 = vector.extract_strided_slice %275 {offsets = [2, 0, 0], sizes = [1, 8, 64], strides = [1, 1, 1]} : vector<8x8x64xf32> to vector<1x8x64xf32>
    %311 = vector.shape_cast %310 : vector<1x8x64xf32> to vector<8x64xf32>
    %312 = arith.mulf %311, %303 : vector<8x64xf32>
    %313 = vector.extract_strided_slice %282 {offsets = [2, 0, 0], sizes = [1, 8, 64], strides = [1, 1, 1]} : vector<8x8x64xf32> to vector<1x8x64xf32>
    %314 = vector.shape_cast %313 : vector<1x8x64xf32> to vector<8x64xf32>
    %315 = arith.addf %312, %314 : vector<8x64xf32>
    %316 = vector.extract_strided_slice %284 {offsets = [2, 0, 0], sizes = [1, 8, 1], strides = [1, 1, 1]} : vector<8x8x1xf32> to vector<1x8x1xf32>
    %317 = vector.shape_cast %316 : vector<1x8x1xf32> to vector<8x1xf32>
    %318 = vector.broadcast %317 : vector<8x1xf32> to vector<8x64xf32>
    %319 = arith.mulf %318, %315 : vector<8x64xf32>
    %cst_59 = arith.constant dense<0.000000e+00> : vector<64xf32>
    %320 = vector.multi_reduction <add>, %319, %cst_59 [0] : vector<8x64xf32> to vector<64xf32>
    %321 = vector.shape_cast %320 : vector<64xf32> to vector<1x64xf32>
    %322 = vector.extract_strided_slice %275 {offsets = [3, 0, 0], sizes = [1, 8, 64], strides = [1, 1, 1]} : vector<8x8x64xf32> to vector<1x8x64xf32>
    %323 = vector.shape_cast %322 : vector<1x8x64xf32> to vector<8x64xf32>
    %324 = arith.mulf %323, %315 : vector<8x64xf32>
    %325 = vector.extract_strided_slice %282 {offsets = [3, 0, 0], sizes = [1, 8, 64], strides = [1, 1, 1]} : vector<8x8x64xf32> to vector<1x8x64xf32>
    %326 = vector.shape_cast %325 : vector<1x8x64xf32> to vector<8x64xf32>
    %327 = arith.addf %324, %326 : vector<8x64xf32>
    %328 = vector.extract_strided_slice %284 {offsets = [3, 0, 0], sizes = [1, 8, 1], strides = [1, 1, 1]} : vector<8x8x1xf32> to vector<1x8x1xf32>
    %329 = vector.shape_cast %328 : vector<1x8x1xf32> to vector<8x1xf32>
    %330 = vector.broadcast %329 : vector<8x1xf32> to vector<8x64xf32>
    %331 = arith.mulf %330, %327 : vector<8x64xf32>
    %cst_60 = arith.constant dense<0.000000e+00> : vector<64xf32>
    %332 = vector.multi_reduction <add>, %331, %cst_60 [0] : vector<8x64xf32> to vector<64xf32>
    %333 = vector.shape_cast %332 : vector<64xf32> to vector<1x64xf32>
    %334 = vector.extract_strided_slice %275 {offsets = [4, 0, 0], sizes = [1, 8, 64], strides = [1, 1, 1]} : vector<8x8x64xf32> to vector<1x8x64xf32>
    %335 = vector.shape_cast %334 : vector<1x8x64xf32> to vector<8x64xf32>
    %336 = arith.mulf %335, %327 : vector<8x64xf32>
    %337 = vector.extract_strided_slice %282 {offsets = [4, 0, 0], sizes = [1, 8, 64], strides = [1, 1, 1]} : vector<8x8x64xf32> to vector<1x8x64xf32>
    %338 = vector.shape_cast %337 : vector<1x8x64xf32> to vector<8x64xf32>
    %339 = arith.addf %336, %338 : vector<8x64xf32>
    %340 = vector.extract_strided_slice %284 {offsets = [4, 0, 0], sizes = [1, 8, 1], strides = [1, 1, 1]} : vector<8x8x1xf32> to vector<1x8x1xf32>
    %341 = vector.shape_cast %340 : vector<1x8x1xf32> to vector<8x1xf32>
    %342 = vector.broadcast %341 : vector<8x1xf32> to vector<8x64xf32>
    %343 = arith.mulf %342, %339 : vector<8x64xf32>
    %cst_61 = arith.constant dense<0.000000e+00> : vector<64xf32>
    %344 = vector.multi_reduction <add>, %343, %cst_61 [0] : vector<8x64xf32> to vector<64xf32>
    %345 = vector.shape_cast %344 : vector<64xf32> to vector<1x64xf32>
    %346 = vector.extract_strided_slice %275 {offsets = [5, 0, 0], sizes = [1, 8, 64], strides = [1, 1, 1]} : vector<8x8x64xf32> to vector<1x8x64xf32>
    %347 = vector.shape_cast %346 : vector<1x8x64xf32> to vector<8x64xf32>
    %348 = arith.mulf %347, %339 : vector<8x64xf32>
    %349 = vector.extract_strided_slice %282 {offsets = [5, 0, 0], sizes = [1, 8, 64], strides = [1, 1, 1]} : vector<8x8x64xf32> to vector<1x8x64xf32>
    %350 = vector.shape_cast %349 : vector<1x8x64xf32> to vector<8x64xf32>
    %351 = arith.addf %348, %350 : vector<8x64xf32>
    %352 = vector.extract_strided_slice %284 {offsets = [5, 0, 0], sizes = [1, 8, 1], strides = [1, 1, 1]} : vector<8x8x1xf32> to vector<1x8x1xf32>
    %353 = vector.shape_cast %352 : vector<1x8x1xf32> to vector<8x1xf32>
    %354 = vector.broadcast %353 : vector<8x1xf32> to vector<8x64xf32>
    %355 = arith.mulf %354, %351 : vector<8x64xf32>
    %cst_62 = arith.constant dense<0.000000e+00> : vector<64xf32>
    %356 = vector.multi_reduction <add>, %355, %cst_62 [0] : vector<8x64xf32> to vector<64xf32>
    %357 = vector.shape_cast %356 : vector<64xf32> to vector<1x64xf32>
    %358 = vector.extract_strided_slice %275 {offsets = [6, 0, 0], sizes = [1, 8, 64], strides = [1, 1, 1]} : vector<8x8x64xf32> to vector<1x8x64xf32>
    %359 = vector.shape_cast %358 : vector<1x8x64xf32> to vector<8x64xf32>
    %360 = arith.mulf %359, %351 : vector<8x64xf32>
    %361 = vector.extract_strided_slice %282 {offsets = [6, 0, 0], sizes = [1, 8, 64], strides = [1, 1, 1]} : vector<8x8x64xf32> to vector<1x8x64xf32>
    %362 = vector.shape_cast %361 : vector<1x8x64xf32> to vector<8x64xf32>
    %363 = arith.addf %360, %362 : vector<8x64xf32>
    %364 = vector.extract_strided_slice %284 {offsets = [6, 0, 0], sizes = [1, 8, 1], strides = [1, 1, 1]} : vector<8x8x1xf32> to vector<1x8x1xf32>
    %365 = vector.shape_cast %364 : vector<1x8x1xf32> to vector<8x1xf32>
    %366 = vector.broadcast %365 : vector<8x1xf32> to vector<8x64xf32>
    %367 = arith.mulf %366, %363 : vector<8x64xf32>
    %cst_63 = arith.constant dense<0.000000e+00> : vector<64xf32>
    %368 = vector.multi_reduction <add>, %367, %cst_63 [0] : vector<8x64xf32> to vector<64xf32>
    %369 = vector.shape_cast %368 : vector<64xf32> to vector<1x64xf32>
    %370 = vector.extract_strided_slice %275 {offsets = [7, 0, 0], sizes = [1, 8, 64], strides = [1, 1, 1]} : vector<8x8x64xf32> to vector<1x8x64xf32>
    %371 = vector.shape_cast %370 : vector<1x8x64xf32> to vector<8x64xf32>
    %372 = arith.mulf %371, %363 : vector<8x64xf32>
    %373 = vector.extract_strided_slice %282 {offsets = [7, 0, 0], sizes = [1, 8, 64], strides = [1, 1, 1]} : vector<8x8x64xf32> to vector<1x8x64xf32>
    %374 = vector.shape_cast %373 : vector<1x8x64xf32> to vector<8x64xf32>
    %375 = arith.addf %372, %374 : vector<8x64xf32>
    %376 = vector.extract_strided_slice %284 {offsets = [7, 0, 0], sizes = [1, 8, 1], strides = [1, 1, 1]} : vector<8x8x1xf32> to vector<1x8x1xf32>
    %377 = vector.shape_cast %376 : vector<1x8x1xf32> to vector<8x1xf32>
    %378 = vector.broadcast %377 : vector<8x1xf32> to vector<8x64xf32>
    %379 = arith.mulf %378, %375 : vector<8x64xf32>
    %cst_64 = arith.constant dense<0.000000e+00> : vector<64xf32>
    %380 = vector.multi_reduction <add>, %379, %cst_64 [0] : vector<8x64xf32> to vector<64xf32>
    %381 = vector.shape_cast %380 : vector<64xf32> to vector<1x64xf32>
    %382 = tpu.concatenate %297, %309, %321, %333, %345, %357, %369, %381 in 0 : vector<1x64xf32>, vector<1x64xf32>, vector<1x64xf32>, vector<1x64xf32>, vector<1x64xf32>, vector<1x64xf32>, vector<1x64xf32>, vector<1x64xf32> -> vector<8x64xf32>
    %383 = tpu.concatenate %267, %382 in 0 : vector<8x64xf32>, vector<8x64xf32> -> vector<16x64xf32>
    %384 = vector.broadcast %5 : vector<1x64xf32> to vector<16x64xf32>
    %385 = arith.mulf %384, %131 : vector<16x64xf32>
    %386 = arith.addf %383, %385 : vector<16x64xf32>
    %cst_65 = arith.constant 0.000000e+00 : f32
    %387 = vector.broadcast %cst_65 : f32 to vector<16x64xf32>
    %388 = arith.subf %387, %64 : vector<16x64xf32>
    %389 = math.exp %388 : vector<16x64xf32>
    %cst_66 = arith.constant 1.000000e+00 : f32
    %390 = vector.broadcast %cst_66 : f32 to vector<16x64xf32>
    %391 = arith.addf %390, %389 : vector<16x64xf32>
    %cst_67 = arith.constant 1.000000e+00 : f32
    %392 = vector.broadcast %cst_67 : f32 to vector<16x64xf32>
    %393 = arith.divf %392, %391 : vector<16x64xf32>
    %394 = arith.mulf %64, %393 : vector<16x64xf32>
    %395 = arith.mulf %386, %394 : vector<16x64xf32>
    %c0_68 = arith.constant 0 : index
    %c0_69 = arith.constant 0 : index
    %396 = vector.load %arg7[%c0_68, %c0_69] : memref<64x32xf32, #tpu.memory_space<vmem>>, vector<64x32xf32>
    %cst_70 = arith.constant dense<0.000000e+00> : vector<16x32xf32>
    %397 = tpu.matmul %395, %396, %cst_70 {dimension_numbers = #tpu.dot_dimension_numbers<[1], [0], [0], [1], [0, 0, 1, 1], [], []>} : vector<16x64xf32>, vector<64x32xf32>, vector<16x32xf32> -> vector<16x32xf32>
    %c0_71 = arith.constant 0 : index
    %c0_72 = arith.constant 0 : index
    %398 = vector.load %arg8[%c0_71, %c0_72] : memref<33x4xf32, #tpu.memory_space<vmem>>, vector<32x4xf32>
    %c32 = arith.constant 32 : index
    %c0_73 = arith.constant 0 : index
    %399 = vector.load %arg8[%c32, %c0_73] : memref<33x4xf32, #tpu.memory_space<vmem>>, vector<1x4xf32>
    %cst_74 = arith.constant dense<0.000000e+00> : vector<16x4xf32>
    %400 = tpu.matmul %397, %398, %cst_74 {dimension_numbers = #tpu.dot_dimension_numbers<[1], [0], [0], [1], [0, 0, 1, 1], [], []>} : vector<16x32xf32>, vector<32x4xf32>, vector<16x4xf32> -> vector<16x4xf32>
    %401 = vector.broadcast %399 : vector<1x4xf32> to vector<16x4xf32>
    %402 = arith.addf %400, %401 : vector<16x4xf32>
    %c0_75 = arith.constant 0 : index
    %c0_76 = arith.constant 0 : index
    %403 = vector.load %arg9[%c0_75, %c0_76] : memref<4x9xf32, #tpu.memory_space<vmem>>, vector<4x8xf32>
    %c0_77 = arith.constant 0 : index
    %c8_78 = arith.constant 8 : index
    %404 = vector.load %arg9[%c0_77, %c8_78] : memref<4x9xf32, #tpu.memory_space<vmem>>, vector<4x1xf32>
    %405 = vector.extract_strided_slice %402 {offsets = [0, 0], sizes = [8, 4], strides = [1, 1]} : vector<16x4xf32> to vector<8x4xf32>
    %cst_79 = arith.constant dense<0.000000e+00> : vector<4x4xf32>
    %406 = tpu.matmul %403, %405, %cst_79 {dimension_numbers = #tpu.dot_dimension_numbers<[1], [0], [0], [1], [0, 0, 1, 1], [], []>} : vector<4x8xf32>, vector<8x4xf32>, vector<4x4xf32> -> vector<4x4xf32>
    %407 = vector.broadcast %404 : vector<4x1xf32> to vector<4x4xf32>
    %408 = arith.addf %406, %407 : vector<4x4xf32>
    %409 = vector.broadcast %21 : vector<1x4xf32> to vector<4x4xf32>
    %410 = arith.mulf %408, %409 : vector<4x4xf32>
    %411 = vector.broadcast %11 : vector<1x4xf32> to vector<4x4xf32>
    %412 = arith.addf %410, %411 : vector<4x4xf32>
    %c0_80 = arith.constant 0 : index
    %c0_81 = arith.constant 0 : index
    %c0_82 = arith.constant 0 : index
    %413 = vector.load %arg10[%c0_80, %c0_81, %c0_82] : memref<2x4x4xf32, #tpu.memory_space<vmem>>, vector<1x4x4xf32>
    %414 = vector.shape_cast %413 : vector<1x4x4xf32> to vector<4x4xf32>
    %415 = vector.shape_cast %412 : vector<4x4xf32> to vector<1x4x4xf32>
    tpu.vector_store %arg10[%c0_80, %c0_81, %c0_82], %415 {strides = array<i32>} : memref<2x4x4xf32, #tpu.memory_space<vmem>>, vector<1x4x4xf32>,
    %416 = vector.extract_strided_slice %402 {offsets = [8, 0], sizes = [8, 4], strides = [1, 1]} : vector<16x4xf32> to vector<8x4xf32>
    %cst_83 = arith.constant dense<0.000000e+00> : vector<4x4xf32>
    %417 = tpu.matmul %403, %416, %cst_83 {dimension_numbers = #tpu.dot_dimension_numbers<[1], [0], [0], [1], [0, 0, 1, 1], [], []>} : vector<4x8xf32>, vector<8x4xf32>, vector<4x4xf32> -> vector<4x4xf32>
    %418 = vector.broadcast %404 : vector<4x1xf32> to vector<4x4xf32>
    %419 = arith.addf %417, %418 : vector<4x4xf32>
    %420 = vector.broadcast %46 : vector<1x4xf32> to vector<4x4xf32>
    %421 = arith.mulf %419, %420 : vector<4x4xf32>
    %422 = vector.broadcast %36 : vector<1x4xf32> to vector<4x4xf32>
    %423 = arith.addf %421, %422 : vector<4x4xf32>
    %c1_84 = arith.constant 1 : index
    %c0_85 = arith.constant 0 : index
    %c0_86 = arith.constant 0 : index
    %424 = vector.load %arg10[%c1_84, %c0_85, %c0_86] : memref<2x4x4xf32, #tpu.memory_space<vmem>>, vector<1x4x4xf32>
    %425 = vector.shape_cast %424 : vector<1x4x4xf32> to vector<4x4xf32>
    %426 = vector.shape_cast %423 : vector<4x4xf32> to vector<1x4x4xf32>
    tpu.vector_store %arg10[%c1_84, %c0_85, %c0_86], %426 {strides = array<i32>} : memref<2x4x4xf32, #tpu.memory_space<vmem>>, vector<1x4x4xf32>,
    return
  }
  func.func @transform_0(%arg0: i32) -> (i32, i32, i32) {
    %c0_i32 = arith.constant 0 : i32
    %c0_i32_0 = arith.constant 0 : i32
    %c0_i32_1 = arith.constant 0 : i32
    %c0_i32_2 = arith.constant 0 : i32
    return %c0_i32, %c0_i32_0, %c0_i32_1 : i32, i32, i32
  }
  func.func @transform_1(%arg0: i32) -> (i32, i32) {
    %c0_i32 = arith.constant 0 : i32
    %c0_i32_0 = arith.constant 0 : i32
    %c0_i32_1 = arith.constant 0 : i32
    return %c0_i32, %c0_i32_0 : i32, i32
  }
  func.func @transform_2(%arg0: i32) -> (i32, i32) {
    %c0_i32 = arith.constant 0 : i32
    %c0_i32_0 = arith.constant 0 : i32
    %c0_i32_1 = arith.constant 0 : i32
    return %c0_i32, %c0_i32_0 : i32, i32
  }
  func.func @transform_3(%arg0: i32) -> (i32, i32) {
    %c0_i32 = arith.constant 0 : i32
    %c0_i32_0 = arith.constant 0 : i32
    %c0_i32_1 = arith.constant 0 : i32
    return %c0_i32, %c0_i32_0 : i32, i32
  }
  func.func @transform_4(%arg0: i32) -> (i32, i32) {
    %c0_i32 = arith.constant 0 : i32
    %c0_i32_0 = arith.constant 0 : i32
    %c0_i32_1 = arith.constant 0 : i32
    return %c0_i32, %c0_i32_0 : i32, i32
  }
  func.func @transform_5(%arg0: i32) -> (i32, i32) {
    %c0_i32 = arith.constant 0 : i32
    %c0_i32_0 = arith.constant 0 : i32
    %c0_i32_1 = arith.constant 0 : i32
    return %c0_i32, %c0_i32_0 : i32, i32
  }
  func.func @transform_6(%arg0: i32) -> (i32, i32) {
    %c0_i32 = arith.constant 0 : i32
    %c0_i32_0 = arith.constant 0 : i32
    %c0_i32_1 = arith.constant 0 : i32
    return %c0_i32, %c0_i32_0 : i32, i32
  }
  func.func @transform_7(%arg0: i32) -> (i32, i32) {
    %c0_i32 = arith.constant 0 : i32
    %c0_i32_0 = arith.constant 0 : i32
    %c0_i32_1 = arith.constant 0 : i32
    return %c0_i32, %c0_i32_0 : i32, i32
  }
  func.func @transform_8(%arg0: i32) -> (i32, i32) {
    %c0_i32 = arith.constant 0 : i32
    %c0_i32_0 = arith.constant 0 : i32
    %c0_i32_1 = arith.constant 0 : i32
    return %c0_i32, %c0_i32_0 : i32, i32
  }
  func.func @transform_9(%arg0: i32) -> (i32, i32, i32) {
    %c0_i32 = arith.constant 0 : i32
    %c0_i32_0 = arith.constant 0 : i32
    %c0_i32_1 = arith.constant 0 : i32
    %c0_i32_2 = arith.constant 0 : i32
    return %c0_i32, %c0_i32_0, %c0_i32_1 : i32, i32, i32
  }
}

</mosaic_0001>

<bundles_post_ra>
// kernel: tpu_custom_call.1
= control target key start
LH: loop header
LB: loop body
LE: loop exit
PB: predicated region body
PF: predicated region fallthrough
CT: control target
= control target key end

     0   :  { %vm40_vm0 = vcmask 31744   ;;  %s2646_s0 = inlined_call_operand.vmem [shape: f32[2,8,4], index: 0, kind: input, shape index: {}]   ;;  %s2647_s1 = inlined_call_operand.vmem [shape: f32[16,32], index: 1, kind: input, shape index: {}]   ;;  %s2648_s2 = inlined_call_operand.vmem [shape: f32[12,32], index: 2, kind: input, shape index: {}]   ;;  %s2649_s3 = inlined_call_operand.vmem [shape: f32[32,128], index: 3, kind: input, shape index: {}]   ;;  %s2650_s4 = inlined_call_operand.vmem [shape: f32[64,18], index: 4, kind: input, shape index: {}]   ;;  %s2651_s5 = inlined_call_operand.vmem [shape: f32[17,64], index: 5, kind: input, shape index: {}]   ;;  %s2652_s6 = inlined_call_operand.vmem [shape: f32[64,32], index: 6, kind: input, shape index: {}]   ;;  %s2653_s7 = inlined_call_operand.vmem [shape: f32[33,4], index: 7, kind: input, shape index: {}]   ;;  %s2654_s8 = inlined_call_operand.vmem [shape: f32[4,9], index: 8, kind: input, shape index: {}]   ;;  %s2655_s9 = inlined_call_operand.hbm [shape: f32[2,4,4], index: 9, kind: output, shape index: {}]  }
   0x1   :  { %v1814_v0 = vld [vmem:[%s2646_s0 + $0x8] sm:$0xff]  ;;  %v39_v1 = vld [vmem:[%s2646_s0] sm:$0xff] }
   0x2   :  { %v91_v2 = vsel %vm40_vm0, %v1814_v0, 0.0  ;;  %v41_v3 = vsel %vm40_vm0, %v39_v1, 0.0 }
   0x3   :  { %14 = vsyncpa [#allocation3], 0  ;;  %v92_v4 = vrot.slane %v91_v2, 4  ;;  %v42_v5 = vrot.slane %v41_v3, 4  ;;  %v135_v50 = vld [vmem:[%s2648_s2] sm:$0xff]  ;;  %vm146_vm5 = vcmask 1043456  }
   0x4   :  { %v136_v51 = vld [vmem:[%s2648_s2 + $0x8] sm:$0xf]  ;;  %vm2115_vm6 = vmmov 1   ;;  %v225_v53 = vld [vmem:[%s2649_s3] sm:$0xff]  ;;  %s2116_s2 = smov 4   ;;  %s2117_s20 = smov 8  }
   0x5   :  { %v93_v6 = vadd.f32 %v92_v4, %v91_v2  ;;  %v43_v7 = vadd.f32 %v42_v5, %v41_v3  ;;  %v1960_v52 = vpack.c.bf16 %v136_v51, %v135_v50  ;;  %vm1961_vm7 = vmpackc.low %vm146_vm5, %vm2115_vm6  ;;  %v226_v54 = vld [vmem:[%s2649_s3 + $0x8] sm:$0xff]  ;;  %vm87_vm8 = vcmask 64512   ;;  %s2118_s26 = smov 112   ;;  %s2119_s27 = smov 64  }
   0x6   :  { %v1966_v55 = vpack.c.bf16 %v226_v54, %v225_v53  ;;  %vm139_vm9 = vcmask 97280   ;;  %vm229_vm10 = vcmask 261120   ;;  %vm340_vm11 = vcmask 1042432  }
   0x7   :  { %v94_v8 = vrot.slane %v93_v6, 2  ;;  %v44_v9 = vrot.slane %v43_v7, 2  ;;  %1962 = vmatprep.subr.msk.bf16.mxu0 %vm1961_vm7, %v1960_v52  ;;  %vm77_vm14 = vcmask 1046528   ;;  %vm458_vm6 = vcmask 523264  }
   0x8   :  { %1965 = vmatpush3.bf16.msk.msra.mxu0 %vm1961_vm7, %v1960_v52  ;;  %1967 = vmatprep.subr.bf16.mxu1 %v1966_v55  ;;  %vm555_vm7 = vcmask 1041408  }
   0x9   :  { %v95_v10 = vadd.f32 %v94_v8, %v93_v6  ;;  %v45_v11 = vadd.f32 %v44_v9, %v43_v7  ;;  %1969 = vmatpush3.bf16.msra.mxu1 %v1966_v55  ;;  %v227_v8 = vld [vmem:[%s2649_s3 + $0x10] sm:$0xff]  ;;  %v228_v9 = vld [vmem:[%s2649_s3 + $0x18] sm:$0xff] }
   0xb   :  { %v96_v12 = vrot.slane %v95_v10, 1  ;;  %v46_v13 = vrot.slane %v45_v11, 1 }
   0xd   :  { %v97_v14 = vadd.f32 %v96_v12, %v95_v10  ;;  %v47_v15 = vadd.f32 %v46_v13, %v45_v11  ;;  %v1970_v10 = vpack.c.bf16 %v228_v9, %v227_v8  ;;  %v137_v11 = vld [vmem:[%s2647_s1] sm:$0xff]  ;;  %v138_v12 = vld [vmem:[%s2647_s1 + $0x8] sm:$0xff] }
   0xf   :  { %v2183_v16 = vmul.f32 0.125, %v97_v14  ;;  %v2185_v17 = vmul.f32 0.125, %v47_v15  ;;  %1971 = vmatprep.subr.bf16.mxu1 %v1970_v10 }
  0x10   :  { %1973 = vmatpush3.bf16.msra.mxu1 %v1970_v10 }
  0x11   :  { %v99_v18 = vsub.f32 %v1814_v0, %v2183_v16  ;;  %v50_v19 = vsub.f32 %v39_v1, %v2185_v17 }
  0x13   :  { %v100_v20 = vmul.f32 %v99_v18, %v99_v18  ;;  %v51_v21 = vmul.f32 %v50_v19, %v50_v19 }
  0x15   :  { %v101_v22 = vsel %vm40_vm0, %v100_v20, 0.0  ;;  %v52_v23 = vsel %vm40_vm0, %v51_v21, 0.0  ;;  %v451_v20 = vld [vmem:[%s2650_s4 + $0x8] sm:$0xff] }
  0x16   :  { %v102_v24 = vrot.slane %v101_v22, 4  ;;  %v53_v25 = vrot.slane %v52_v23, 4 }
  0x18   :  { %v103_v26 = vadd.f32 %v102_v24, %v101_v22  ;;  %v54_v27 = vadd.f32 %v53_v25, %v52_v23  ;;  %v452_v22 = vld [vmem:[%s2650_s4 + $0x10] sm:$0xff]  ;;  %v453_v23 = vld [vmem:[%s2650_s4 + $0x18] sm:$0xff]  ;;  %v454_v25 = vld [vmem:[%s2650_s4 + $0x20] sm:$0xff] }
  0x19   :  { %v1978_v24 = vpack.c.bf16 %v453_v23, %v452_v22 }
  0x1a   :  { %v104_v28 = vrot.slane %v103_v26, 2  ;;  %v55_v29 = vrot.slane %v54_v27, 2 }
  0x1c   :  { %v105_v30 = vadd.f32 %v104_v28, %v103_v26  ;;  %v56_v31 = vadd.f32 %v55_v29, %v54_v27  ;;  %v455_v26 = vld [vmem:[%s2650_s4 + $0x28] sm:$0xff]  ;;  %v456_v28 = vld [vmem:[%s2650_s4 + $0x30] sm:$0xff]  ;;  %v457_v29 = vld [vmem:[%s2650_s4 + $0x38] sm:$0xff] }
  0x1d   :  { %v1982_v27 = vpack.c.bf16 %v455_v26, %v454_v25 }
  0x1e   :  { %v106_v32 = vrot.slane %v105_v30, 1  ;;  %v57_v33 = vrot.slane %v56_v31, 1 }
  0x20   :  { %v107_v34 = vadd.f32 %v106_v32, %v105_v30  ;;  %v58_v35 = vadd.f32 %v57_v33, %v56_v31  ;;  %v1986_v30 = vpack.c.bf16 %v457_v29, %v456_v28  ;;  %v311_v31 = vlaneseq }
  0x22   :  { %v108_v36 = vmul.f32 0.125, %v107_v34  ;;  %v59_v37 = vmul.f32 0.125, %v58_v35  ;;  %v2254_v32 = vshrl.u32 %v311_v31, 7  ;;  %v34_v35 = vld [vmem:[%s2651_s5 + $0x8] sm:$0xf] }
  0x24   :  { %v109_v38 = vadd.f32 1e-05, %v108_v36  ;;  %v60_v39 = vadd.f32 1e-05, %v59_v37  ;;  %v313_v33 = vadd.s32 8, %v2254_v32  ;;  %v2258_v34 = vsub.s32 3, %v2254_v32 }
  0x25   :  { %v318_v36 = vand.u32 7, %v2254_v32 }
  0x26   :  { %2025 = vrsqrt.f32 %v109_v38  ;;  %vm112_vm1 = vcmp.eq.f32.partialorder %v109_v38, inf  ;;  %v115_v41 = vand.u32 2147483648, %v109_v38  ;;  %vm114_vm2 = vcmp.eq.f32.partialorder %v109_v38, 0.0 }
  0x27   :  { %2027 = vrsqrt.f32 %v60_v39  ;;  %vm63_vm3 = vcmp.eq.f32.partialorder %v60_v39, inf  ;;  %v66_v44 = vand.u32 2147483648, %v60_v39  ;;  %vm65_vm4 = vcmp.eq.f32.partialorder %v60_v39, 0.0 }
  0x28   :  { %v325_v37 = vand.u32 7, %v313_v33  ;;  %vm352_vm12 = vcmp.ge.s32.totalorder %v318_v36, 3  ;;  %vm368_vm15 = vcmp.ge.s32.totalorder %v318_v36, 2 }
  0x2a   :  { %vm353_vm13 = vcmp.ge.s32.totalorder %v325_v37, 3 }
  0x30   :  { %v2026_v40 = vpop.eup %2025 }
  0x31   :  { %v2028_v42 = vpop.eup %2027  ;;  %v111_v43 = vmul.f32 %v2026_v40, %v109_v38  ;;  %v419_v40 = vrot.slane %v34_v35, %v2258_v34 }
  0x32   :  { %v62_v45 = vmul.f32 %v2028_v42, %v60_v39 }
  0x33   :  { %v113_v46 = vsel %vm112_vm1, %v109_v38, %v111_v43  ;;  %v2265_v38 = vsub.s32 0, %v2254_v32  ;;  %vm398_vm1 = vcmask 1045504  }
  0x34   :  { %v2191_v47 = vsel %vm114_vm2, %v115_v41, %v113_v46  ;;  %v64_v48 = vsel %vm63_vm3, %v60_v39, %v62_v45  ;;  %v2268_v39 = vsub.s32 1, %v2254_v32  ;;  %v2272_v41 = vsub.s32 2, %v2254_v32 }
  0x35   :  { %2029 = vrcp.f32 %v2191_v47  ;;  %v2194_v49 = vsel %vm65_vm4, %v66_v44, %v64_v48  ;;  %v363_v45 = vrot.slane %v34_v35, %v2265_v38  ;;  %vm393_vm2 = vcmp.ge.s32.totalorder %v325_v37, 1 }
  0x36   :  { %2031 = vrcp.f32 %v2194_v49  ;;  %v387_v48 = vrot.slane %v34_v35, %v2268_v39  ;;  %vm392_vm3 = vcmp.ge.s32.totalorder %v318_v36, 1  ;;  %v411_v51 = vrot.slane %v34_v35, %v2272_v41 }
  0x37   :  { %vm426_vm4 = vcmask 1044480  }
  0x3f   :  { %v2030_v56 = vpop.eup %2029 }
  0x40   :  { %v2032_v57 = vpop.eup %2031  ;;  %v118_v58 = vmul.f32 %v2030_v56, %v99_v18 }
  0x41   :  { %v69_v59 = vmul.f32 %v2032_v57, %v50_v19  ;;  %v450_v19 = vld [vmem:[%s2650_s4] sm:$0xff]  ;;  %v1820_v57 = vld [vmem:[%s2651_s5 + $0xe] ss:$0 sm:$0xff] }
  0x42   :  { %126 = vrot.lane.b32.xlu1 %v118_v58, %s2116_s2  ;;  %v123_v60 = vrot.slane %v118_v58, 1  ;;  %v120_v63 = vrot.slane %v118_v58, 7  ;;  %v1974_v21 = vpack.c.bf16 %v451_v20, %v450_v19 }
  0x43   :  { %79 = vrot.lane.b32.xlu0 %v69_v59, %s2116_s2  ;;  %v75_v61 = vrot.slane %v69_v59, 1  ;;  %v71_v1 = vrot.slane %v69_v59, 7 }
  0x44   :  { %1975 = vmatprep.subr.bf16.mxu0 %v1974_v21 }
  0x46   :  { %130 = vrot.lane.b32.xlu1 %v123_v60, %s2117_s20 }
  0x47   :  { %83 = vrot.lane.b32.xlu0 %v75_v61, %s2117_s20 }
  0xb4   :  { %v127_v62 = vpop.permute.xlu1 %126 }
  0xb5   :  { %v80_v0 = vpop.permute.xlu0 %79  ;;  %v133_v2 = vsel %vm40_vm0, %v120_v63, %v127_v62 }
  0xb6   :  { %v86_v4 = vsel %vm40_vm0, %v71_v1, %v80_v0  ;;  %vm369_vm0 = vcmp.ge.s32.totalorder %v325_v37, 2 }
  0xb8   :  { %v131_v3 = vpop.permute.xlu1 %130 }
  0xb9   :  { %v134_v5 = vsel %vm87_vm8, %v133_v2, %v131_v3  ;;  %v84_v6 = vpop.permute.xlu0 %83 }
  0xba   :  { %v88_v7 = vsel %vm87_vm8, %v86_v4, %v84_v6 }
  0xbb   :  { %1882 = vmatprep.mubr.msk.f32.mxu0 %vm139_vm9, %v88_v7 }
  0xbc   :  { %1883 = vmatmul.mubr.msk.f32.vlgmr.msra.gmra.mrb[0].mxu0 %vm139_vm9, %v134_v5  ;;  %vm550_vm9 = vcmask 15360  }
  0xbd   :  { %1977 = vmatpush3.bf16.msra.mxu0 %v1974_v21 }
  0xbe   :  { %1979 = vmatprep.subr.bf16.mxu0 %v1978_v24 }
  0xc1   :  { %1981 = vmatpush3.bf16.msra.mxu0 %v1978_v24 }
  0xc2   :  { %1983 = vmatprep.subr.bf16.mxu0 %v1982_v27 }
  0xc5   :  { %1985 = vmatpush3.bf16.msra.mxu0 %v1982_v27 }
  0xc6   :  { %1987 = vmatprep.subr.bf16.mxu0 %v1986_v30 }
  0xc9   :  { %1989 = vmatpush3.bf16.msra.mxu0 %v1986_v30 }
 0x18f   :  { %v1884_v13 = vpop.f32.mrb[0].mxu0 }
 0x190   :  { %v216_v14 = vpop.f32.mrb[1].mxu0  ;;  %v222_v18 = vadd.f32 %v1884_v13, %v138_v12 }
 0x191   :  { %v217_v15 = vadd.f32 %v216_v14, %v137_v11 }
 0x193   :  { %1893 = vmatprep.mubr.msk.f32.mxu1 %vm229_vm10, %v217_v15 }
 0x194   :  { %1894 = vmatmul.mubr.msk.f32.vlgmr.msra.gmra.mrb[0].mxu1 %vm229_vm10, %v222_v18 }
 0x267   :  { %v2274_v42 = vpop.f32.mrb[0].mxu1 }
 0x268   :  { %v342_v43 = vrot.slane %v2274_v42, 5  ;;  %v2277_v44 = vpop.f32.mrb[1].mxu1 }
 0x269   :  { %v341_v46 = vrot.slane %v2277_v44, 5 }
 0x26a   :  { %v422_v50 = vmul.f32 %v419_v40, %v342_v43  ;;  %v378_v52 = vrot.slane %v342_v43, 1  ;;  %v402_v55 = vrot.slane %v342_v43, 2 }
 0x26b   :  { %v343_v53 = vsel %vm340_vm11, %v341_v46, %v342_v43  ;;  %v347_v54 = vsel %vm340_vm11, 0.0, %v341_v46 }
 0x26c   :  { %v430_v56 = vrot.slane %v422_v50, 3  ;;  %v358_v58 = vsel %vm352_vm12, %v347_v54, 0.0  ;;  %v359_v59 = vsel %vm353_vm13, %v343_v53, 0.0  ;;  %v375_v62 = vrot.slane %v347_v54, 1 }
 0x26d   :  { %v364_v60 = vmul.f32 %v363_v45, %v358_v58  ;;  %v365_v61 = vmul.f32 %v363_v45, %v359_v59  ;;  %v376_v63 = vrot.slane %v343_v53, 1  ;;  %v399_v0 = vrot.slane %v347_v54, 2 }
 0x26e   :  { %v400_v1 = vrot.slane %v343_v53, 2  ;;  %v420_v2 = vmul.f32 %v419_v40, %v347_v54  ;;  %v421_v3 = vmul.f32 %v419_v40, %v343_v53  ;;  %vm73_vm12 = vcmask 1040384  }
 0x26f   :  { %v366_v4 = vadd.f32 %v1820_v57, %v364_v60  ;;  %v367_v5 = vadd.f32 %v1820_v57, %v365_v61  ;;  %v377_v6 = vsel %vm77_vm14, %v375_v62, %v376_v63  ;;  %v379_v7 = vsel %vm77_vm14, %v376_v63, %v378_v52 }
 0x270   :  { %v382_v8 = vsel %vm368_vm15, %v377_v6, 0.0  ;;  %v383_v9 = vsel %vm369_vm0, %v379_v7, 0.0  ;;  %v401_v10 = vsel %vm398_vm1, %v399_v0, %v400_v1  ;;  %v403_v11 = vsel %vm398_vm1, %v400_v1, %v402_v55 }
 0x271   :  { %v389_v12 = vmul.f32 %v387_v48, %v383_v9  ;;  %v407_v13 = vsel %vm393_vm2, %v403_v11, 0.0  ;;  %v427_v14 = vrot.slane %v420_v2, 3  ;;  %v428_v15 = vrot.slane %v421_v3, 3 }
 0x272   :  { %v388_v18 = vmul.f32 %v387_v48, %v382_v8  ;;  %v406_v19 = vsel %vm392_vm3, %v401_v10, 0.0  ;;  %v413_v21 = vmul.f32 %v411_v51, %v407_v13  ;;  %v799_v57 = vsub.s32 4, %v2254_v32 }
 0x273   :  { %v391_v20 = vadd.f32 %v389_v12, %v367_v5  ;;  %v429_v22 = vsel %vm426_vm4, %v427_v14, %v428_v15  ;;  %v431_v23 = vsel %vm426_vm4, %v428_v15, %v430_v56  ;;  %v412_v25 = vmul.f32 %v411_v51, %v406_v19  ;;  %v35_v51 = vld [vmem:[%s2651_s5 + $0xc] sm:$0x3] }
 0x274   :  { %v390_v24 = vadd.f32 %v388_v18, %v366_v4  ;;  %1915 = vmatprep.subr.msk.mxu1 %vm555_vm7, %v35_v51  ;;  %v806_v60 = vsub.s32 5, %v2254_v32  ;;  %v813_v63 = vsub.s32 6, %v2254_v32  ;;  %v1440_v3 = vsub.f32 0.0, %v2274_v42 }
 0x275   :  { %v415_v26 = vadd.f32 %v413_v21, %v391_v20  ;;  %1916 = vmatpush3.msk.msra.mxu1 %vm555_vm7, %v35_v51  ;;  %v1439_v4 = vsub.f32 0.0, %v2277_v44  ;;  %v820_v8 = vsub.s32 7, %v2254_v32 }
 0x276   :  { %v414_v27 = vadd.f32 %v412_v25, %v390_v24  ;;  %v1443_v6 = vmul.f32 1.442695, %v1440_v3  ;;  %v1466_v25 = vld [vmem:[%s2652_s6 + $0x18] sm:$0xff]  ;;  %v33_v3 = vld [vmem:[%s2651_s5] sm:$0xff] }
 0x277   :  { %v435_v28 = vadd.f32 %v431_v23, %v415_v26  ;;  %v1441_v7 = vmul.f32 1.442695, %v1439_v4  ;;  %v1463_v23 = vld [vmem:[%s2652_s6] sm:$0xff] }
 0x278   :  { %v434_v29 = vadd.f32 %v429_v22, %v414_v27  ;;  %v1467_v27 = vld [vmem:[%s2652_s6 + $0x20] sm:$0xff] }
 0x279   :  { %v437_v30 = vsub.f32 0.0, %v435_v28 }
 0x27a   :  { %v436_v31 = vsub.f32 0.0, %v434_v29 }
 0x27b   :  { %v440_v33 = vmul.f32 1.442695, %v437_v30  ;;  %v1469_v30 = vld [vmem:[%s2652_s6 + $0x30] sm:$0xff] }
 0x27c   :  { %v438_v35 = vmul.f32 1.442695, %v436_v31  ;;  %v1470_v31 = vld [vmem:[%s2652_s6 + $0x38] sm:$0xff] }
 0x27d   :  { %2033 = vpow2.f32 %v440_v33  ;;  %v2002_v33 = vpack.c.bf16 %v1470_v31, %v1469_v30 }
 0x27e   :  { %2035 = vpow2.f32 %v438_v35  ;;  %v1823_v35 = vld [vmem:[%s2651_s5 + $0xf] ss:$0 sm:$0xff] }
 0x287   :  { %v2034_v36 = vpop.eup %2033 }
 0x288   :  { %v2036_v37 = vpop.eup %2035  ;;  %v443_v40 = vadd.f32 1.0, %v2034_v36 }
 0x289   :  { %v442_v43 = vadd.f32 1.0, %v2036_v37 }
 0x28a   :  { %2037 = vrcp.f32 %v443_v40 }
 0x28b   :  { %2039 = vrcp.f32 %v442_v43 }
 0x28c   :  { %2041 = vpow2.f32 %v1443_v6  ;;  %v652_v6 = vmul.f32 1.442695, %v33_v3 }
 0x28d   :  { %2043 = vpow2.f32 %v1441_v7  ;;  %v2120_v7 = vmov 1966171168  }
 0x294   :  { %v2038_v45 = vpop.eup %2037 }
 0x295   :  { %v2040_v46 = vpop.eup %2039  ;;  %v2300_v48 = vmul.f32 %v2038_v45, %v435_v28  ;;  %v1468_v28 = vld [vmem:[%s2652_s6 + $0x28] sm:$0xff] }
 0x296   :  { %v2302_v50 = vmul.f32 %v2040_v46, %v434_v29  ;;  %v2042_v11 = vpop.eup %2041  ;;  %v1998_v29 = vpack.c.bf16 %v1468_v28, %v1467_v27 }
 0x297   :  { %v2044_v12 = vpop.eup %2043  ;;  %v1446_v13 = vadd.f32 1.0, %v2042_v11 }
 0x298   :  { %1912 = vmatprep.mubr.msk.f32.mxu0 %vm458_vm6, %v2302_v50  ;;  %v1445_v14 = vadd.f32 1.0, %v2044_v12 }
 0x299   :  { %1913 = vmatmul.mubr.msk.f32.vlgmr.msra.gmra.mrb[2].mxu0 %vm458_vm6, %v2300_v48  ;;  %2045 = vrcp.f32 %v1446_v13 }
 0x29a   :  { %2047 = vrcp.f32 %v1445_v14 }
 0x2a3   :  { %v2046_v15 = vpop.eup %2045 }
 0x2a4   :  { %v2048_v18 = vpop.eup %2047  ;;  %v1452_v19 = vmul.f32 %v2046_v15, %v2274_v42  ;;  %v1464_v42 = vld [vmem:[%s2652_s6 + $0x8] sm:$0xff] }
 0x2a5   :  { %v1451_v20 = vmul.f32 %v2048_v18, %v2277_v44  ;;  %v1465_v44 = vld [vmem:[%s2652_s6 + $0x10] sm:$0xff]  ;;  %v1990_v24 = vpack.c.bf16 %v1464_v42, %v1463_v23 }
 0x2a6   :  { %v1994_v26 = vpack.c.bf16 %v1466_v25, %v1465_v44 }
 0x2a7   :  { %1991 = vmatprep.subr.bf16.mxu1 %v1990_v24 }
 0x36c   :  { %v1914_v52 = vpop.f32.mrb[2].mxu0 }
 0x36d   :  { %548 = vrot.lane.b32.xlu1 %v1914_v52, %s2118_s26  ;;  %v531_v53 = vpop.f32.mrb[3].mxu0  ;;  %v1160_v54 = vrot.slane %v1914_v52, %v2265_v38  ;;  %v1167_v55 = vrot.slane %v1914_v52, %v2268_v39  ;;  %v1181_v56 = vrot.slane %v1914_v52, %v2258_v34  ;;  %v1174_v58 = vrot.slane %v1914_v52, %v2272_v41 }
 0x36e   :  { %546 = vrot.lane.b32.xlu0 %v531_v53, %s2118_s26  ;;  %v1188_v59 = vrot.slane %v1914_v52, %v799_v57  ;;  %v1195_v61 = vrot.slane %v1914_v52, %v806_v60  ;;  %v772_v62 = vrot.slane %v531_v53, %v2265_v38  ;;  %v779_v0 = vrot.slane %v531_v53, %v2268_v39 }
 0x36f   :  { %v1202_v1 = vrot.slane %v1914_v52, %v813_v63  ;;  %v786_v2 = vrot.slane %v531_v53, %v2272_v41  ;;  %v793_v5 = vrot.slane %v531_v53, %v2258_v34  ;;  %v800_v39 = vrot.slane %v531_v53, %v799_v57  ;;  %v1552_v57 = vld [vmem:[%s2653_s7] sm:$0xff] }
 0x370   :  { %v1209_v41 = vrot.slane %v1914_v52, %v820_v8  ;;  %v807_v9 = vrot.slane %v531_v53, %v806_v60  ;;  %v814_v10 = vrot.slane %v531_v53, %v813_v63  ;;  %v821_v34 = vrot.slane %v531_v53, %v820_v8 }
 0x371   :  { %1162 = vbcast.lane.b32.xlu1 %v1160_v54, 256  ;;  %v658_v8 = vunpack.c.l.s4 %v2120_v7 }
 0x372   :  { %1318 = vbcast.lane.b32.xlu0 %v1167_v55, 264 }
 0x375   :  { %1169 = vbcast.lane.b32.xlu1 %v1167_v55, 256 }
 0x376   :  { %1326 = vbcast.lane.b32.xlu0 %v1181_v56, 264 }
 0x379   :  { %1176 = vbcast.lane.b32.xlu1 %v1174_v58, 256 }
 0x37a   :  { %1330 = vbcast.lane.b32.xlu0 %v1188_v59, 264 }
 0x37d   :  { %1183 = vbcast.lane.b32.xlu1 %v1181_v56, 256 }
 0x37e   :  { %1334 = vbcast.lane.b32.xlu0 %v1195_v61, 264 }
 0x381   :  { %1190 = vbcast.lane.b32.xlu1 %v1188_v59, 256  ;;  %v1554_v59 = vld [vmem:[%s2653_s7 + $0x10] sm:$0xff] }
 0x382   :  { %774 = vbcast.lane.b32.xlu0 %v772_v62, 256 }
 0x385   :  { %1197 = vbcast.lane.b32.xlu1 %v1195_v61, 256 }
 0x386   :  { %781 = vbcast.lane.b32.xlu0 %v779_v0, 256 }
 0x389   :  { %1204 = vbcast.lane.b32.xlu1 %v1202_v1, 256 }
 0x38a   :  { %788 = vbcast.lane.b32.xlu0 %v786_v2, 256 }
 0x38d   :  { %1314 = vbcast.lane.b32.xlu1 %v1160_v54, 264 }
 0x38e   :  { %795 = vbcast.lane.b32.xlu0 %v793_v5, 256 }
 0x391   :  { %1322 = vbcast.lane.b32.xlu1 %v1174_v58, 264  ;;  %v1553_v58 = vld [vmem:[%s2653_s7 + $0x8] sm:$0xff] }
 0x392   :  { %802 = vbcast.lane.b32.xlu0 %v800_v39, 256  ;;  %v2006_v61 = vpack.c.bf16 %v1553_v58, %v1552_v57 }
 0x394   :  { %2007 = vmatprep.subr.bf16.mxu0 %v2006_v61 }
 0x395   :  { %1211 = vbcast.lane.b32.xlu1 %v1209_v41, 256  ;;  %2009 = vmatpush3.bf16.msra.mxu0 %v2006_v61 }
 0x396   :  { %809 = vbcast.lane.b32.xlu0 %v807_v9, 256 }
 0x399   :  { %930 = vbcast.lane.b32.xlu1 %v779_v0, 264 }
 0x39a   :  { %816 = vbcast.lane.b32.xlu0 %v814_v10, 256 }
 0x39d   :  { %823 = vbcast.lane.b32.xlu1 %v821_v34, 256 }
 0x39e   :  { %926 = vbcast.lane.b32.xlu0 %v772_v62, 264  ;;  %v1555_v62 = vld [vmem:[%s2653_s7 + $0x18] sm:$0xff] }
 0x39f   :  { %v2010_v63 = vpack.c.bf16 %v1555_v62, %v1554_v59 }
 0x3a1   :  { %946 = vbcast.lane.b32.xlu1 %v807_v9, 264  ;;  %2011 = vmatprep.subr.bf16.mxu0 %v2010_v63 }
 0x3a2   :  { %934 = vbcast.lane.b32.xlu0 %v786_v2, 264  ;;  %2013 = vmatpush3.bf16.msra.mxu0 %v2010_v63 }
 0x3a5   :  { %950 = vbcast.lane.b32.xlu1 %v814_v10, 264  ;;  %v659_v10 = vunpack.c.0.s8 %v658_v8 }
 0x3a6   :  { %938 = vbcast.lane.b32.xlu0 %v793_v5, 264 }
 0x3a7   :  { %v2395_v13 = vsub.s32 %v659_v10, %v2254_v32 }
 0x3a9   :  { %954 = vbcast.lane.b32.xlu1 %v821_v34, 264 }
 0x3aa   :  { %942 = vbcast.lane.b32.xlu0 %v800_v39, 264 }
 0x3ad   :  { %1342 = vbcast.lane.b32.xlu1 %v1209_v41, 264 }
 0x3ae   :  { %1338 = vbcast.lane.b32.xlu0 %v1202_v1, 264 }
 0x3b1   :  { %1457 = vrot.lane.b32.xlu1 %v1452_v19, %s2119_s27 }
 0x3b2   :  { %1455 = vrot.lane.b32.xlu0 %v1451_v20, %s2119_s27 }
 0x3df   :  { %v549_v22 = vpop.permute.xlu1 %548 }
 0x3e0   :  { %v547_v21 = vpop.permute.xlu0 %546 }
 0x3e1   :  { %1917 = vmatprep.mubr.msk.f32.mxu1 %vm550_vm9, %v547_v21 }
 0x3e2   :  { %1918 = vmatmul.mubr.msk.f32.vlgmr.msra.gmra.mrb[2].mxu1 %vm550_vm9, %v549_v22 }
 0x3e3   :  { %1993 = vmatpush3.bf16.msra.mxu1 %v1990_v24  ;;  %v2363_v55 = vpop.permute.xlu1 %1162 }
 0x3e4   :  { %1995 = vmatprep.subr.bf16.mxu1 %v1994_v26  ;;  %v2361_v53 = vpop.permute.xlu0 %1318 }
 0x3e7   :  { %1997 = vmatpush3.bf16.msra.mxu1 %v1994_v26  ;;  %v2379_v0 = vpop.permute.xlu1 %1169 }
 0x3e8   :  { %1999 = vmatprep.subr.bf16.mxu1 %v1998_v29  ;;  %v2374_v60 = vpop.permute.xlu0 %1326 }
 0x3eb   :  { %2001 = vmatpush3.bf16.msra.mxu1 %v1998_v29  ;;  %v2386_v5 = vpop.permute.xlu1 %1176 }
 0x3ec   :  { %2003 = vmatprep.subr.bf16.mxu1 %v2002_v33  ;;  %v2381_v2 = vpop.permute.xlu0 %1330 }
 0x3ef   :  { %2005 = vmatpush3.bf16.msra.mxu1 %v2002_v33  ;;  %v2390_v9 = vpop.permute.xlu1 %1183 }
 0x3f0   :  { %v2388_v41 = vpop.permute.xlu0 %1334 }
 0x3f3   :  { %v2397_v18 = vpop.permute.xlu1 %1190 }
 0x3f4   :  { %v2392_v12 = vpop.permute.xlu0 %774 }
 0x3f7   :  { %v2403_v24 = vpop.permute.xlu1 %1197 }
 0x3f8   :  { %v2400_v22 = vpop.permute.xlu0 %781 }
 0x3fc   :  { %v2412_v33 = vpop.permute.xlu0 %788 }
 0x400   :  { %v2424_v62 = vpop.permute.xlu0 %795 }
 0x4b5   :  { %v1919_v36 = vpop.f32.mrb[2].mxu1 }
 0x4b6   :  { %v631_v37 = vadd.f32 %v1919_v36, %v1823_v35  ;;  %v625_v40 = vpop.f32.mrb[3].mxu1 }
 0x4b7   :  { %v2358_v43 = vadd.f32 %v1823_v35, %v625_v40  ;;  %v2416_v40 = vpop.permute.xlu1 %1204 }
 0x4b8   :  { %v637_v45 = vand.u32 2147483647, %v631_v37  ;;  %v635_v14 = vmax.f32 %v631_v37, 0.0 }
 0x4b9   :  { %v636_v46 = vand.u32 2147483647, %v2358_v43  ;;  %v634_v57 = vmax.f32 %v2358_v43, 0.0 }
 0x4ba   :  { %v639_v51 = vsub.f32 0.0, %v637_v45 }
 0x4bb   :  { %v638_v54 = vsub.f32 0.0, %v636_v46 }
 0x4bc   :  { %v642_v52 = vmul.f32 1.442695, %v639_v51 }
 0x4bd   :  { %v640_v56 = vmul.f32 1.442695, %v638_v54 }
 0x4be   :  { %2049 = vpow2.f32 %v642_v52 }
 0x4bf   :  { %2051 = vpow2.f32 %v640_v56 }
 0x4c8   :  { %v2050_v1 = vpop.eup %2049 }
 0x4c9   :  { %v645_v4 = vadd.f32 1.0, %v2050_v1  ;;  %v2052_v39 = vpop.eup %2051 }
 0x4ca   :  { %v644_v11 = vadd.f32 1.0, %v2052_v39 }
 0x4cb   :  { %2053 = vlog2.f32 %v645_v4 }
 0x4cc   :  { %2055 = vpow2.f32 %v652_v6  ;;  %v1315_v6 = vpop.permute.xlu1 %1314 }
 0x4cd   :  { %2057 = vlog2.f32 %v644_v11 }
 0x4d5   :  { %v2054_v34 = vpop.eup %2053 }
 0x4d6   :  { %v649_v15 = vmul.f32 0.6931472, %v2054_v34  ;;  %v2056_v20 = vpop.eup %2055  ;;  %v2436_v34 = vpop.permute.xlu0 %802 }
 0x4d7   :  { %v2405_v25 = vsub.f32 0.0, %v2056_v20  ;;  %v2058_v28 = vpop.eup %2057 }
 0x4d8   :  { %v651_v19 = vadd.f32 %v649_v15, %v635_v14  ;;  %v647_v51 = vmul.f32 0.6931472, %v2058_v28 }
 0x4da   :  { %v1051_v21 = vrot.slane %v651_v19, %v2395_v13  ;;  %v1044_v23 = vcombine.high %v651_v19, %v651_v19  ;;  %v1213_v31 = vmul.f32 %v651_v19, %v2300_v48  ;;  %v2426_v63 = vadd.f32 %v647_v51, %v634_v57 }
 0x4dc   :  { %v1059_v42 = vcombine.high %v1051_v21, %v1051_v21  ;;  %v1067_v44 = vrot.slane %v1051_v21, %v2395_v13  ;;  %v1058_v29 = vrot.slane %v1044_v23, %v2395_v13  ;;  %v1222_v56 = vrot.slane %v1213_v31, %v2395_v13  ;;  %v2440_v21 = vpop.permute.xlu1 %1322 }
 0x4dd   :  { %v663_v39 = vrot.slane %v2426_v63, %v2395_v13 }
 0x4de   :  { %v1081_v32 = vrot.slane %v1059_v42, %v2395_v13  ;;  %v1089_v26 = vcombine.high %v1067_v44, %v1067_v44  ;;  %v1096_v27 = vrot.slane %v1067_v44, %v2265_v38  ;;  %v1060_v52 = vcombine.high %v1058_v29, %v1058_v29 }
 0x4df   :  { %v1074_v54 = vrot.slane %v1058_v29, %v2395_v13  ;;  %v1230_v3 = vcombine.high %v1222_v56, %v1222_v56  ;;  %v1238_v4 = vrot.slane %v1222_v56, %v2395_v13  ;;  %v1215_v42 = vcombine.high %v1213_v31, %v1213_v31 }
 0x4e0   :  { %v1100_v30 = vrot.slane %v1081_v32, %v2265_v38  ;;  %v1091_v35 = vcombine.high %v1081_v32, %v1081_v32  ;;  %v1104_v36 = vrot.slane %v1089_v26, %v2265_v38  ;;  %v1133_v37 = vmul.f32 %v1096_v27, %v2405_v25 }
 0x4e1   :  { %v1088_v1 = vrot.slane %v1060_v52, %v2395_v13  ;;  %v1112_v7 = vrot.slane %v1074_v54, %v2265_v38  ;;  %v1252_v10 = vrot.slane %v1230_v3, %v2395_v13  ;;  %v1267_v11 = vrot.slane %v1238_v4, %v2265_v38 }
 0x4e2   :  { %v1134_v45 = vmul.f32 %v1100_v30, %v2405_v25  ;;  %v1141_v46 = vmul.f32 1.442695, %v1133_v37  ;;  %v1108_v58 = vrot.slane %v1091_v35, %v2265_v38  ;;  %v1135_v59 = vmul.f32 %v1104_v36, %v2405_v25 }
 0x4e3   :  { %v1116_v14 = vrot.slane %v1088_v1, %v2265_v38  ;;  %v1137_v15 = vmul.f32 %v1112_v7, %v2405_v25  ;;  %v1090_v23 = vcombine.high %v1074_v54, %v1074_v54  ;;  %v679_v44 = vrot.slane %v663_v39, %v2395_v13 }
 0x4e4   :  { %2059 = vpow2.f32 %v1141_v46  ;;  %v1143_v61 = vmul.f32 1.442695, %v1134_v45  ;;  %v1136_v43 = vmul.f32 %v1108_v58, %v2405_v25  ;;  %v1145_v8 = vmul.f32 1.442695, %v1135_v59  ;;  %v2446_v45 = vpop.permute.xlu0 %809  ;;  %v2455_v58 = vpop.permute.xlu1 %1211 }
 0x4e5   :  { %v1260_v32 = vcombine.high %v1238_v4, %v1238_v4  ;;  %v1271_v26 = vrot.slane %v1252_v10, %v2265_v38  ;;  %v1304_v27 = vmul.f32 %v1267_v11, %v2363_v55  ;;  %v1138_v29 = vmul.f32 %v1116_v14, %v2405_v25 }
 0x4e6   :  { %2061 = vpow2.f32 %v1143_v61  ;;  %v1147_v19 = vmul.f32 1.442695, %v1136_v43  ;;  %v1149_v30 = vmul.f32 1.442695, %v1137_v15  ;;  %v671_v36 = vcombine.high %v663_v39, %v663_v39 }
 0x4e7   :  { %2063 = vpow2.f32 %v1145_v8  ;;  %v1120_v46 = vrot.slane %v1090_v23, %v2265_v38  ;;  %v1229_v31 = vrot.slane %v1215_v42, %v2395_v13  ;;  %v1262_v51 = vcombine.high %v1252_v10, %v1252_v10 }
 0x4e8   :  { %2065 = vpow2.f32 %v1147_v19  ;;  %v656_v52 = vcombine.high %v2426_v63, %v2426_v63  ;;  %v1275_v55 = vrot.slane %v1260_v32, %v2265_v38  ;;  %v1305_v54 = vmul.f32 %v1271_v26, %v2379_v0  ;;  %v2464_v15 = vpop.permute.xlu0 %816 }
 0x4e9   :  { %v708_v57 = vrot.slane %v679_v44, %v2265_v38  ;;  %v1092_v59 = vcombine.high %v1088_v1, %v1088_v1  ;;  %2067 = vpow2.f32 %v1149_v30  ;;  %v1151_v61 = vmul.f32 1.442695, %v1138_v29 }
 0x4ea   :  { %v693_v4 = vrot.slane %v671_v36, %v2395_v13  ;;  %v1139_v43 = vmul.f32 %v1120_v46, %v2405_v25  ;;  %v1231_v8 = vcombine.high %v1229_v31, %v1229_v31  ;;  %v1245_v39 = vrot.slane %v1229_v31, %v2395_v13 }
 0x4eb   :  { %v670_v10 = vrot.slane %v656_v52, %v2395_v13  ;;  %v1279_v0 = vrot.slane %v1262_v51, %v2265_v38  ;;  %v1306_v11 = vmul.f32 %v1275_v55, %v2386_v5  ;;  %v745_v1 = vmul.f32 %v708_v57, %v2405_v25 }
 0x4ec   :  { %v1124_v19 = vrot.slane %v1092_v59, %v2265_v38  ;;  %2069 = vpow2.f32 %v1151_v61  ;;  %v701_v42 = vcombine.high %v679_v44, %v679_v44  ;;  %v712_v32 = vrot.slane %v693_v4, %v2265_v38  ;;  %v2486_v57 = vpop.permute.xlu0 %926 }
 0x4ed   :  { %v2471_v29 = vrot.slane %v1231_v8, %v2395_v13  ;;  %v672_v5 = vcombine.high %v670_v10, %v670_v10  ;;  %v2475_v30 = vmul.f32 %v2426_v63, %v2302_v50  ;;  %v1283_v36 = vrot.slane %v1245_v39, %v2265_v38 }
 0x4ee   :  { %v2060_v20 = vpop.eup %2059  ;;  %v753_v44 = vmul.f32 1.442695, %v745_v1  ;;  %v1261_v46 = vcombine.high %v1245_v39, %v1245_v39  ;;  %v703_v51 = vcombine.high %v693_v4, %v693_v4  ;;  %v686_v55 = vrot.slane %v670_v10, %v2395_v13 }
 0x4ef   :  { %v1344_v28 = vmul.f32 0.0, %v2060_v20  ;;  %v746_v63 = vmul.f32 %v712_v32, %v2405_v25  ;;  %v700_v61 = vrot.slane %v672_v5, %v2395_v13  ;;  %v1308_v4 = vmul.f32 %v1283_v36, %v2397_v18 }
 0x4f0   :  { %v2062_v37 = vpop.eup %2061  ;;  %v1291_v10 = vrot.slane %v1261_v46, %v2265_v38  ;;  %v724_v32 = vrot.slane %v686_v55, %v2265_v38 }
 0x4f1   :  { %v1345_v35 = vadd.f32 %v1344_v28, %v1304_v27  ;;  %v2064_v7 = vpop.eup %2063  ;;  %v2468_v27 = vpop.permute.xlu1 %930  ;;  %v1153_v28 = vmul.f32 1.442695, %v1139_v43  ;;  %v755_v18 = vmul.f32 1.442695, %v746_v63  ;;  %v728_v36 = vrot.slane %v700_v61, %v2265_v38 }
 0x4f2   :  { %v2066_v26 = vpop.eup %2065 }
 0x4f3   :  { %v1354_v56 = vmul.f32 %v2062_v37, %v1345_v35  ;;  %v1346_v20 = vmul.f32 %v1345_v35, %v1315_v6  ;;  %v1307_v6 = vmul.f32 %v1279_v0, %v2390_v9  ;;  %v1140_v37 = vmul.f32 %v1124_v19, %v2405_v25 }
 0x4f4   :  { %2071 = vpow2.f32 %v1153_v28  ;;  %v1287_v9 = vrot.slane %v2471_v29, %v2265_v38  ;;  %v720_v0 = vrot.slane %v703_v51, %v2265_v38 }
 0x4f5   :  { %v1355_v3 = vadd.f32 %v1354_v56, %v1305_v54  ;;  %v1347_v31 = vsel %vm458_vm6, %v1346_v20, 0.0  ;;  %v716_v54 = vrot.slane %v701_v42, %v2265_v38  ;;  %v2068_v56 = vpop.eup %2067  ;;  %2073 = vpow2.f32 %v753_v44  ;;  %v2494_v8 = vpop.permute.xlu1 %823 }
 0x4f6   :  { %v1155_v39 = vmul.f32 1.442695, %v1140_v37  ;;  %v2070_v1 = vpop.eup %2069  ;;  %v704_v42 = vcombine.high %v700_v61, %v700_v61  ;;  %v1263_v61 = vcombine.high %v2471_v29, %v2471_v29 }
 0x4f7   :  { %v1364_v14 = vmul.f32 %v2064_v7, %v1355_v3  ;;  %v1356_v59 = vmul.f32 %v1355_v3, %v2361_v53  ;;  %v1348_v7 = vrot.slane %v1347_v31, 4  ;;  %v702_v53 = vcombine.high %v686_v55, %v686_v55 }
 0x4f8   :  { %v747_v3 = vmul.f32 %v716_v54, %v2405_v25  ;;  %2075 = vpow2.f32 %v1155_v39  ;;  %v736_v55 = vrot.slane %v704_v42, %v2265_v38  ;;  %v749_v54 = vmul.f32 %v724_v32, %v2405_v25 }
 0x4f9   :  { %v1365_v23 = vadd.f32 %v1364_v14, %v1306_v11  ;;  %v834_v11 = vrot.slane %v2475_v30, %v2395_v13  ;;  %v1357_v19 = vsel %vm458_vm6, %v1356_v59, 0.0  ;;  %v1349_v28 = vadd.f32 %v1348_v7, %v1347_v31  ;;  %v2515_v51 = vpop.permute.xlu1 %946 }
 0x4fa   :  { %v1358_v46 = vrot.slane %v1357_v19, 4  ;;  %2077 = vpow2.f32 %v755_v18  ;;  %v732_v31 = vrot.slane %v702_v53, %v2265_v38  ;;  %v1310_v18 = vmul.f32 %v1291_v10, %v2416_v40 }
 0x4fb   :  { %v1374_v35 = vmul.f32 %v2066_v26, %v1365_v23  ;;  %v1366_v20 = vmul.f32 %v1365_v23, %v2440_v21  ;;  %v1309_v26 = vmul.f32 %v1287_v9, %v2403_v24  ;;  %v842_v44 = vcombine.high %v834_v11, %v834_v11 }
 0x4fc   :  { %v850_v37 = vrot.slane %v834_v11, %v2395_v13  ;;  %v757_v23 = vmul.f32 1.442695, %v747_v3  ;;  %v1350_v63 = vrot.slane %v1349_v28, 2  ;;  %v827_v9 = vcombine.high %v2475_v30, %v2475_v30 }
 0x4fd   :  { %v2481_v52 = vadd.f32 %v1374_v35, %v1307_v6  ;;  %v2509_v6 = vpop.permute.xlu0 %934  ;;  %v748_v35 = vmul.f32 %v720_v0, %v2405_v25  ;;  %v1367_v24 = vsel %vm458_vm6, %v1366_v20, 0.0  ;;  %v864_v7 = vrot.slane %v842_v44, %v2395_v13 }
 0x4fe   :  { %v2072_v59 = vpop.eup %2071  ;;  %v1359_v0 = vadd.f32 %v1358_v46, %v1357_v19  ;;  %v1368_v11 = vrot.slane %v1367_v24, 4  ;;  %2079 = vpow2.f32 %v757_v23  ;;  %v751_v30 = vmul.f32 %v732_v31, %v2405_v25 }
 0x4ff   :  { %v1384_v43 = vmul.f32 %v2068_v56, %v2481_v52  ;;  %v750_v56 = vmul.f32 %v728_v36, %v2405_v25  ;;  %v2074_v39 = vpop.eup %2073  ;;  %v761_v29 = vmul.f32 1.442695, %v749_v54  ;;  %v1351_v20 = vadd.f32 %v1350_v63, %v1349_v28 }
 0x500   :  { %v1376_v42 = vmul.f32 %v2481_v52, %v2374_v60  ;;  %v841_v19 = vrot.slane %v827_v9, %v2395_v13  ;;  %v883_v36 = vrot.slane %v864_v7, %v2265_v38  ;;  %v956_v40 = vmul.f32 0.0, %v2074_v39 }
 0x501   :  { %v2500_v14 = vadd.f32 %v1384_v43, %v1308_v4  ;;  %v759_v4 = vmul.f32 1.442695, %v748_v35  ;;  %v879_v43 = vrot.slane %v850_v37, %v2265_v38  ;;  %v2529_v3 = vpop.permute.xlu0 %938  ;;  %v763_v32 = vmul.f32 1.442695, %v750_v56 }
 0x502   :  { %v1360_v10 = vrot.slane %v1359_v0, 2  ;;  %v1369_v44 = vadd.f32 %v1368_v11, %v1367_v24  ;;  %v1295_v28 = vrot.slane %v1263_v61, %v2265_v38  ;;  %v765_v60 = vmul.f32 1.442695, %v751_v30 }
 0x503   :  { %v1394_v5 = vmul.f32 %v2070_v1, %v2500_v14  ;;  %v752_v1 = vmul.f32 %v736_v55, %v2405_v25  ;;  %v916_v35 = vmul.f32 %v879_v43, %v2392_v12  ;;  %2081 = vpow2.f32 %v759_v4  ;;  %v2076_v25 = vpop.eup %2075 }
 0x504   :  { %2083 = vpow2.f32 %v761_v29  ;;  %v2078_v23 = vpop.eup %2077  ;;  %v1352_v31 = vrot.slane %v1351_v20, 1  ;;  %v1377_v55 = vsel %vm458_vm6, %v1376_v42, 0.0  ;;  %v874_v12 = vcombine.high %v864_v7, %v864_v7 }
 0x505   :  { %v2513_v21 = vadd.f32 %v1394_v5, %v1309_v26  ;;  %v2537_v26 = vpop.permute.xlu1 %950  ;;  %v872_v5 = vcombine.high %v850_v37, %v850_v37  ;;  %v957_v52 = vadd.f32 %v956_v40, %v916_v35  ;;  %2085 = vpow2.f32 %v763_v32  ;;  %v2543_v54 = vpop.permute.xlu0 %942 }
 0x506   :  { %v767_v37 = vmul.f32 1.442695, %v752_v1  ;;  %v917_v24 = vmul.f32 %v883_v36, %v2400_v22  ;;  %v1361_v9 = vadd.f32 %v1360_v10, %v1359_v0  ;;  %v843_v4 = vcombine.high %v841_v19, %v841_v19 }
 0x507   :  { %v1404_v53 = vmul.f32 %v2072_v59, %v2513_v21  ;;  %v887_v63 = vrot.slane %v872_v5, %v2265_v38  ;;  %v966_v56 = vmul.f32 %v2078_v23, %v957_v52  ;;  %v1370_v59 = vrot.slane %v1369_v44, 2 }
 0x508   :  { %v1386_v39 = vmul.f32 %v2500_v14, %v2381_v2  ;;  %2087 = vpow2.f32 %v765_v60  ;;  %v1378_v7 = vrot.slane %v1377_v55, 4  ;;  %v857_v30 = vrot.slane %v841_v19, %v2395_v13 }
 0x509   :  { %v1405_v46 = vadd.f32 %v1404_v53, %v1310_v18  ;;  %v2547_v43 = vpop.permute.xlu1 %954  ;;  %v967_v11 = vadd.f32 %v966_v56, %v917_v24  ;;  %v2080_v53 = vpop.eup %2079  ;;  %v1311_v18 = vmul.f32 %v1295_v28, %v2455_v58  ;;  %2089 = vpow2.f32 %v767_v37 }
 0x50a   :  { %v2553_v22 = vadd.f32 %v1352_v31, %v1351_v20  ;;  %v891_v0 = vrot.slane %v874_v12, %v2265_v38  ;;  %v918_v1 = vmul.f32 %v887_v63, %v2412_v33  ;;  %v1362_v42 = vrot.slane %v1361_v9, 1  ;;  %v1339_v14 = vpop.permute.xlu0 %1338 }
 0x50b   :  { %v1414_v61 = vmul.f32 %v2076_v25, %v1405_v46  ;;  %v976_v29 = vmul.f32 %v2080_v53, %v967_v11  ;;  %v1371_v32 = vadd.f32 %v1370_v59, %v1369_v44  ;;  %v871_v2 = vrot.slane %v843_v4, %v2395_v13 }
 0x50c   :  { %v1387_v36 = vsel %vm458_vm6, %v1386_v39, 0.0  ;;  %v1396_v58 = vmul.f32 %v2513_v21, %v2388_v41  ;;  %v968_v19 = vmul.f32 %v967_v11, %v2468_v27  ;;  %v1379_v40 = vadd.f32 %v1378_v7, %v1377_v55 }
 0x50d   :  { %v1415_v5 = vadd.f32 %v1414_v61, %v1311_v18  ;;  %v977_v20 = vadd.f32 %v976_v29, %v918_v1  ;;  %v2082_v35 = vpop.eup %2081  ;;  %v1406_v10 = vmul.f32 %v1405_v46, %v1339_v14  ;;  %v873_v25 = vcombine.high %v857_v30, %v857_v30  ;;  %v1343_v44 = vpop.permute.xlu1 %1342 }
 0x50e   :  { %v895_v33 = vrot.slane %v857_v30, %v2265_v38  ;;  %v2084_v28 = vpop.eup %2083  ;;  %v919_v60 = vmul.f32 %v891_v0, %v2424_v62  ;;  %v958_v13 = vmul.f32 %v957_v52, %v2486_v57  ;;  %v2566_v41 = vadd.f32 %v1362_v42, %v1361_v9 }
 0x50f   :  { %v978_v23 = vmul.f32 %v977_v20, %v2509_v6  ;;  %v986_v31 = vmul.f32 %v2082_v35, %v977_v20  ;;  %v2086_v37 = vpop.eup %2085  ;;  %v1388_v27 = vrot.slane %v1387_v36, 4  ;;  %v875_v21 = vcombine.high %v871_v2, %v871_v2 }
 0x510   :  { %v1416_v12 = vmul.f32 %v1415_v5, %v1343_v44  ;;  %v1372_v55 = vrot.slane %v1371_v32, 1  ;;  %v1397_v46 = vsel %vm458_vm6, %v1396_v58, 0.0  ;;  %v969_v63 = vsel %vm458_vm6, %v968_v19, 0.0 }
 0x511   :  { %v987_v24 = vadd.f32 %v986_v31, %v919_v60  ;;  %v1380_v56 = vrot.slane %v1379_v40, 2  ;;  %v899_v62 = vrot.slane %v871_v2, %v2265_v38  ;;  %v979_v57 = vsel %vm458_vm6, %v978_v23, 0.0 }
 0x512   :  { %v1407_v6 = vsel %vm458_vm6, %v1406_v10, 0.0  ;;  %v2088_v52 = vpop.eup %2087  ;;  %v920_v9 = vmul.f32 %v895_v33, %v2436_v34  ;;  %v959_v59 = vsel %vm458_vm6, %v958_v13, 0.0  ;;  %v1389_v11 = vadd.f32 %v1388_v27, %v1387_v36 }
 0x513   :  { %v988_v61 = vmul.f32 %v987_v24, %v2529_v3  ;;  %v996_v4 = vmul.f32 %v2084_v28, %v987_v24  ;;  %v2090_v39 = vpop.eup %2089  ;;  %v1398_v53 = vrot.slane %v1397_v46, 4  ;;  %v970_v18 = vrot.slane %v969_v63, 4 }
 0x514   :  { %v1417_v7 = vsel %vm458_vm6, %v1416_v12, 0.0  ;;  %v980_v30 = vrot.slane %v979_v57, 4  ;;  %v1408_v29 = vrot.slane %v1407_v6, 4  ;;  %v2578_v42 = vadd.f32 %v1372_v55, %v1371_v32 }
 0x515   :  { %v989_v0 = vsel %vm458_vm6, %v988_v61, 0.0  ;;  %v997_v1 = vadd.f32 %v996_v4, %v920_v9  ;;  %v903_v34 = vrot.slane %v873_v25, %v2265_v38  ;;  %v960_v5 = vrot.slane %v959_v59, 4 }
 0x516   :  { %v990_v2 = vrot.slane %v989_v0, 4  ;;  %v921_v3 = vmul.f32 %v899_v62, %v2446_v45  ;;  %v1418_v58 = vrot.slane %v1417_v7, 4  ;;  %v1381_v19 = vadd.f32 %v1380_v56, %v1379_v40 }
 0x517   :  { %v998_v14 = vmul.f32 %v997_v1, %v2543_v54  ;;  %v1006_v36 = vmul.f32 %v2086_v37, %v997_v1  ;;  %v1390_v20 = vrot.slane %v1389_v11, 2  ;;  %v971_v35 = vadd.f32 %v970_v18, %v969_v63 }
 0x518   :  { %v1399_v10 = vadd.f32 %v1398_v53, %v1397_v46  ;;  %v981_v33 = vadd.f32 %v980_v30, %v979_v57  ;;  %v1409_v32 = vadd.f32 %v1408_v29, %v1407_v6  ;;  %v907_v25 = vrot.slane %v875_v21, %v2265_v38 }
 0x519   :  { %v999_v28 = vsel %vm458_vm6, %v998_v14, 0.0  ;;  %v1007_v44 = vadd.f32 %v1006_v36, %v921_v3  ;;  %v961_v60 = vadd.f32 %v960_v5, %v959_v59  ;;  %v991_v23 = vadd.f32 %v990_v2, %v989_v0 }
 0x51a   :  { %v1000_v13 = vrot.slane %v999_v28, 4  ;;  %v922_v45 = vmul.f32 %v903_v34, %v2464_v15  ;;  %v1419_v40 = vadd.f32 %v1418_v58, %v1417_v7  ;;  %v1391_v37 = vadd.f32 %v1390_v20, %v1389_v11 }
 0x51b   :  { %v1008_v54 = vmul.f32 %v1007_v44, %v2515_v51  ;;  %v1016_v31 = vmul.f32 %v2088_v52, %v1007_v44  ;;  %v972_v27 = vrot.slane %v971_v35, 2  ;;  %v1400_v55 = vrot.slane %v1399_v10, 2 }
 0x51c   :  { %v1001_v12 = vadd.f32 %v1000_v13, %v999_v28  ;;  %v982_v46 = vrot.slane %v981_v33, 2  ;;  %v1410_v56 = vrot.slane %v1409_v32, 2  ;;  %v923_v38 = vmul.f32 %v907_v25, %v2494_v8 }
 0x51d   :  { %v1017_v63 = vadd.f32 %v1016_v31, %v922_v45  ;;  %v1009_v24 = vsel %vm458_vm6, %v1008_v54, 0.0  ;;  %v962_v21 = vrot.slane %v961_v60, 2  ;;  %v992_v62 = vrot.slane %v991_v23, 2 }
 0x51e   :  { %v1010_v57 = vrot.slane %v1009_v24, 4  ;;  %v1002_v15 = vrot.slane %v1001_v12, 2  ;;  %v1420_v52 = vrot.slane %v1419_v40, 2  ;;  %v973_v9 = vadd.f32 %v972_v27, %v971_v35 }
 0x51f   :  { %v1026_v6 = vmul.f32 %v2090_v39, %v1017_v63  ;;  %v1018_v51 = vmul.f32 %v1017_v63, %v2537_v26  ;;  %v1382_v61 = vrot.slane %v1381_v19, 1  ;;  %v1401_v4 = vadd.f32 %v1400_v55, %v1399_v10 }
 0x520   :  { %v1011_v59 = vadd.f32 %v1010_v57, %v1009_v24  ;;  %v983_v11 = vadd.f32 %v982_v46, %v981_v33  ;;  %v1411_v7 = vadd.f32 %v1410_v56, %v1409_v32  ;;  %v963_v30 = vadd.f32 %v962_v21, %v961_v60 }
 0x521   :  { %v1019_v53 = vsel %vm458_vm6, %v1018_v51, 0.0  ;;  %v1027_v18 = vadd.f32 %v1026_v6, %v923_v38  ;;  %v993_v0 = vadd.f32 %v992_v62, %v991_v23  ;;  %v1003_v29 = vadd.f32 %v1002_v15, %v1001_v12  ;;  %v1827_v62 = vld [vmem:[%s2651_s5 + $0x10] ss:$0 sm:$0xff] }
 0x522   :  { %v1012_v8 = vrot.slane %v1011_v59, 2  ;;  %v1020_v1 = vrot.slane %v1019_v53, 4  ;;  %v1392_v34 = vrot.slane %v1391_v37, 1  ;;  %v1421_v5 = vadd.f32 %v1420_v52, %v1419_v40 }
 0x523   :  { %v1028_v39 = vmul.f32 %v1027_v18, %v2547_v43  ;;  %v974_v26 = vrot.slane %v973_v9, 1  ;;  %v1424_v14 = vsel %vm73_vm12, %v2553_v22, %v2566_v41  ;;  %v984_v36 = vrot.slane %v983_v11, 1 }
 0x524   :  { %v1013_v2 = vadd.f32 %v1012_v8, %v1011_v59  ;;  %v1021_v3 = vadd.f32 %v1020_v1, %v1019_v53  ;;  %v1402_v20 = vrot.slane %v1401_v4, 1  ;;  %v1412_v35 = vrot.slane %v1411_v7, 1  ;;  %v1456_v8 = vpop.permute.xlu0 %1455  ;;  %v1458_v1 = vpop.permute.xlu1 %1457 }
 0x525   :  { %v1029_v58 = vsel %vm458_vm6, %v1028_v39, 0.0  ;;  %v964_v10 = vrot.slane %v963_v30, 1  ;;  %v994_v33 = vrot.slane %v993_v0, 1  ;;  %v1004_v32 = vrot.slane %v1003_v29, 1 }
 0x526   :  { %v1022_v28 = vrot.slane %v1021_v3, 2  ;;  %v1030_v44 = vrot.slane %v1029_v58, 4  ;;  %v1383_v43 = vadd.f32 %v1382_v61, %v1381_v19  ;;  %v1393_v25 = vadd.f32 %v1392_v34, %v1391_v37 }
 0x527   :  { %v1422_v60 = vrot.slane %v1421_v5, 1  ;;  %v975_v13 = vadd.f32 %v974_v26, %v973_v9  ;;  %v1014_v23 = vrot.slane %v1013_v2, 1  ;;  %v985_v31 = vadd.f32 %v984_v36, %v983_v11 }
 0x528   :  { %v1023_v45 = vadd.f32 %v1022_v28, %v1021_v3  ;;  %v1031_v54 = vadd.f32 %v1030_v44, %v1029_v58  ;;  %v1403_v40 = vadd.f32 %v1402_v20, %v1401_v4  ;;  %v1413_v22 = vadd.f32 %v1412_v35, %v1411_v7 }
 0x529   :  { %v1425_v41 = vsel %vm555_vm7, %v1424_v14, %v2578_v42  ;;  %v965_v27 = vadd.f32 %v964_v10, %v963_v30  ;;  %v995_v12 = vadd.f32 %v994_v33, %v993_v0  ;;  %v1005_v63 = vadd.f32 %v1004_v32, %v1003_v29 }
 0x52a   :  { %v1024_v55 = vrot.slane %v1023_v45, 1  ;;  %v1032_v46 = vrot.slane %v1031_v54, 2  ;;  %v1423_v24 = vadd.f32 %v1422_v60, %v1421_v5  ;;  %v1426_v19 = vsel %vm340_vm11, %v1425_v41, %v1383_v43 }
 0x52b   :  { %v1015_v37 = vadd.f32 %v1014_v23, %v1013_v2  ;;  %v1036_v38 = vsel %vm73_vm12, %v965_v27, %v975_v13  ;;  %v1427_v21 = vsel %vm146_vm5, %v1426_v19, %v1393_v25  ;;  %v1436_v11 = vmul.f32 %v1827_v62, %v2300_v48  ;;  %v1830_v2 = vld [vmem:[%s2653_s7 + $0x20] ss:$0 sm:$0xff]  ;;  %s2124_s7 = smov [#allocation2]  }
 0x52c   :  { %v1033_v56 = vadd.f32 %v1032_v46, %v1031_v54  ;;  %v1025_v57 = vadd.f32 %v1024_v55, %v1023_v45  ;;  %v1037_v42 = vsel %vm555_vm7, %v1036_v38, %v985_v31  ;;  %v1428_v6 = vsel %vm426_vm4, %v1427_v21, %v1403_v40 }
 0x52d   :  { %v1038_v51 = vsel %vm340_vm11, %v1037_v42, %v995_v12  ;;  %v1429_v52 = vsel %vm398_vm1, %v1428_v6, %v1413_v22  ;;  %v1435_v18 = vmul.f32 %v1827_v62, %v2302_v50  ;;  %v2121_v48 = vmov 0.0   ;;  %v1642_v50 = vld [vmem:[%s2654_s8] sm:$0xf]  ;;  %s1803_s8 = sshll.u32 %s2124_s7, 4  ;;  %s1804_s8 = int_to_ptr.vmem [resolvable:$true] %s1803_s8 }
 0x52e   :  { %v1034_v15 = vrot.slane %v1033_v56, 1  ;;  %v1039_v9 = vsel %vm146_vm5, %v1038_v51, %v1005_v63  ;;  %v1430_v59 = vsel %vm77_vm14, %v1429_v52, %v1423_v24  ;;  %1955 = vmatprep.subr.mxu1 %v2121_v48  ;;  %1950 = vmatprep.subr.mxu0 %v2121_v48  ;;  %vm2122_vm5 = vmmov 0   ;;  %s2091_s0 = scalar_lea.vmem %s1804_s8, 128  ;;  %p2096_p1 = scmp.lt.s32.totalorder %s1804_s8, %s1804_s8 }
 0x52f   :  { %v1040_v4 = vsel %vm426_vm4, %v1039_v9, %v1015_v37  ;;  %v1438_v30 = vadd.f32 %v1436_v11, %v1430_v59  ;;  %v2123_v26 = vmov 8   ;;  %p2092_p0 = scmp.ne.s32.totalorder %s1804_s8, %s2091_s0  ;;  %p2097_p2 = scmp.lt.s32.totalorder %s2091_s0, %s2091_s0 }
 0x530   :  { %v1035_v61 = vadd.f32 %v1034_v15, %v1033_v56  ;;  %v1041_v53 = vsel %vm398_vm1, %v1040_v4, %v1025_v57  ;;  %2024 = vset.pattern.permute.xlu0 %v2123_v26 }
 0x531   :  { %v1462_v39 = vmul.f32 %v1458_v1, %v1438_v30  ;;  %1645 = vperm.xlu0 %2024, %v1642_v50   ;;  %p2098_p3 = por %p2097_p2, %p2096_p1 }
 0x532   :  { %v1042_v7 = vsel %vm77_vm14, %v1041_v53, %v1035_v61 }
 0x533   :  { %v1437_v0 = vadd.f32 %v1435_v18, %v1042_v7  ;;  %p2099_p4 = pnand %p2098_p3, %p2092_p0 }
 0x535   :  { %v1461_v29 = vmul.f32 %v1456_v8, %v1437_v0 }
 0x537   :  { %1936 = vmatprep.mubr.msk.f32.mxu1 %vm458_vm6, %v1461_v29 }
 0x538   :  { %1937 = vmatmul.mubr.msk.f32.vlgmr.msra.gmra.mrb[4].mxu1 %vm458_vm6, %v1462_v39 }
 0x539   :  { %1957 = vmatprep.mubr.msk.f32.mxu1 %vm2122_vm5, %v2121_v48 }
 0x5b0   :  { %v1646_v20 = vpop.permute.xlu0 %1645 }
 0x60b   :  { %v1938_v34 = vpop.f32.mrb[4].mxu1 }
 0x60c   :  { %v1543_v5 = vpop.f32.mrb[5].mxu1 }
 0x60d   :  { %1947 = vmatprep.mubr.msk.f32.mxu0 %vm229_vm10, %v1543_v5 }
 0x60e   :  { %1948 = vmatmul.mubr.msk.f32.vlgmr.msra.gmra.mrb[4].mxu0 %vm229_vm10, %v1938_v34  ;;  %vm1722_vm10 = vcmask 27648  }
 0x60f   :  { %1952 = vmatprep.mubr.msk.f32.mxu0 %vm2122_vm5, %v2121_v48 }
 0x6e1   :  { %v1949_v3 = vpop.f32.mrb[4].mxu0 }
 0x6e2   :  { %v1639_v14 = vadd.f32 %v1949_v3, %v1830_v2  ;;  %v1633_v36 = vpop.f32.mrb[5].mxu0 }
 0x6e3   :  { %v1634_v58 = vadd.f32 %v1830_v2, %v1633_v36 }
 0x6e4   :  { %1956 = vmatpush3.msra.mxu1 %v1639_v14 }
 0x6e5   :  { %1951 = vmatpush3.msra.mxu0 %v1634_v58  ;;  %1958 = vmatmul.mubr.msk.f32.vlgmr.msra.gmra.mrb[6].mxu1 %vm87_vm8, %v1642_v50 }
 0x6e6   :  { %1953 = vmatmul.mubr.msk.f32.vlgmr.msra.gmra.mrb[6].mxu0 %vm87_vm8, %v1642_v50 }
 0x7b8   :  { %v1790_v35 = vpop.f32.mrb[6].mxu1 }
 0x7b9   :  { %v1716_v10 = vpop.f32.mrb[6].mxu0  ;;  %v1791_v33 = vadd.f32 %v1790_v35, %v1646_v20  ;;  %v1959_v28 = vpop.f32.mrb[7].mxu1 }
 0x7ba   :  { %v1717_v44 = vadd.f32 %v1716_v10, %v1646_v20  ;;  %v1954_v32 = vpop.f32.mrb[7].mxu0 }
 0x7bb   :  { %v1794_v43 = vmul.f32 %v1791_v33, %v2191_v47 }
 0x7bc   :  { %v1720_v25 = vmul.f32 %v1717_v44, %v2194_v49 }
 0x7bd   :  { %v1795_v60 = vadd.f32 %v1794_v43, %v2183_v16 }
 0x7be   :  { %v1721_v13 = vadd.f32 %v1720_v25, %v2185_v17 }
 0x7bf   :  { %1797 = vst.msk [vmem:[#allocation2 + $0x4] sm:$0xf] %vm1722_vm10, %v1795_v60 }
 0x7c0   :  { %1723 = vst.msk [vmem:[#allocation2] sm:$0xf] %vm1722_vm10, %v1721_v13 }
 0x7c1   :  { %2102 = shalt.err (!%p2099_p4)
}
 0x7c2   :  { %s2103_s15 = scalar_lea.hbm %s2655_s9, 128 }
 0x7c3   :  { %p2104_p5 = scmp.ne.s32.totalorder %s2655_s9, %s2103_s15  ;;  %p2107_p6 = scmp.lt.u32.totalorder %s2103_s15, %s2655_s9 }
 0x7c5   :  { %p2109_p7 = pnand %p2107_p6, %p2104_p5 }
 0x7c7   :  { %2112 = shalt.err (!%p2109_p7)
}
 0x7c8   :  { %1809 = dma.vmem_to_hbm [thread:$0]  %s1804_s8, 128, %s2655_s9, [#allocation3], %s2119_s27, %s2119_s27, %s2116_s2  }
 0x7c9   :  { %2113 = dma.done.wait [#allocation3], 128  }
 0x7ca   :  { %2114 = vsyncadd [#allocation3], 4294967168 }
 0x7cb   :  { %1813 = vsyncpa [#allocation3], 1 }

</bundles_post_ra>
